<compile_context>
chip_gen: v5e
topology: v5e:2x2
jax: 0.10.0
libtpu: 0.0.40
codegen_flags: <defaults>
</compile_context>

<pallas_src>
import math

import jax
import jax.numpy as jnp
from jax.experimental import pallas as pl
from jax.experimental.pallas import tpu as pltpu


def _make_transformer_block_kernel(batch, seq, c2, num_heads, has_conv):
    """Build the per-layer TransformerBlock kernel (static shapes captured in closure)."""
    head_dim = c2 // num_heads
    assert head_dim * num_heads == c2
    n_tokens = batch * seq

    def kernel(*refs):
        idx = 0
        tok_ref = refs[idx]; idx += 1
        if has_conv:
            cw_ref, cb_ref = refs[idx:idx + 2]; idx += 2
        lw_ref, lb_ref = refs[idx:idx + 2]; idx += 2
        wqkv_ref, bqkv_ref, wo_ref, bo_ref, wf_ref = refs[idx:idx + 5]; idx += 5
        out_ref = refs[idx]

        # --- one-time preamble (fused conv+BN+ReLU, block linear) on grid step 0 ---
        @pl.when(pl.program_id(0) == 0)
        def _init():
            x0 = tok_ref[...]                                   # f32 (B*S, c1 or c2)
            if has_conv:
                x0 = jnp.dot(x0.astype(jnp.bfloat16), cw_ref[...],
                             preferred_element_type=jnp.float32) + cb_ref[...]
                x0 = jnp.maximum(x0, 0.0)
            x0 = x0 + (jnp.dot(x0.astype(jnp.bfloat16), lw_ref[...],
                               preferred_element_type=jnp.float32) + lb_ref[...])
            out_ref[...] = x0

        # --- one transformer layer per grid step; x is carried in the output block ---
        x = out_ref[...]                                        # f32 (B*S, C)
        xb = x.astype(jnp.bfloat16)

        # Fused QKV: single wide matmul, 1/sqrt(head_dim) already folded into Wq/bq.
        qkv = jnp.dot(xb, wqkv_ref[...], preferred_element_type=jnp.float32) + bqkv_ref[...]
        q3 = qkv[:, :c2].reshape(batch, seq, c2).astype(jnp.bfloat16)       # 128-aligned slice
        k3 = qkv[:, c2:2 * c2].reshape(batch, seq, c2).astype(jnp.bfloat16)
        v3 = qkv[:, 2 * c2:].reshape(batch, seq, c2).astype(jnp.bfloat16)

        o = None
        for h in range(num_heads):
            lo = h * head_dim
            qh = q3[:, :, lo:lo + head_dim]                     # (B, S, D) bf16
            kh = k3[:, :, lo:lo + head_dim]
            vh = v3[:, :, lo:lo + head_dim]
            s = jnp.einsum('bqd,bkd->bqk', qh, kh,
                           preferred_element_type=jnp.float32)  # scale pre-folded
            s = s - jnp.max(s, axis=-1, keepdims=True)
            e = jnp.exp(s)
            denom = jnp.sum(e, axis=-1, keepdims=True)
            av = jnp.einsum('bqk,bkd->bqd', e.astype(jnp.bfloat16), vh,
                            preferred_element_type=jnp.float32)
            # Normalize the small (B,S,D) tensor after AV, with the approx EUP reciprocal.
            av = av * pl.reciprocal(denom, approx=True)
            # Accumulate this head directly into the out-projection (no concat).
            contrib = jnp.dot(av.reshape(n_tokens, head_dim).astype(jnp.bfloat16),
                              wo_ref[h], preferred_element_type=jnp.float32)
            o = contrib if o is None else o + contrib

        x = x + o + bo_ref[...]                                 # MHA residual (f32)
        # fc2(fc1(x)) pre-multiplied into a single effective weight.
        y = jnp.dot(x.astype(jnp.bfloat16), wf_ref[...], preferred_element_type=jnp.float32)
        out_ref[...] = x + y                                    # FFN residual (f32)

    return kernel


def transformer_block_forward(x, prepared_args, *, c2, num_heads, num_layers, has_conv):
    """Run the fused Pallas TransformerBlock forward on NCHW input x."""
    b, c1, w, h = x.shape
    s = w * h
    n_tokens = b * s
    head_dim = c2 // num_heads

    # NCHW -> lane-dense token matrix (B*S, C): channels on the 128-lane axis.
    tokens = jnp.transpose(x.reshape(b, c1, s), (0, 2, 1)).reshape(n_tokens, c1)
    tokens = tokens.astype(jnp.float32)

    kernel = _make_transformer_block_kernel(b, s, c2, num_heads, has_conv)

    const2 = lambda l: (0, 0)
    in_specs = [pl.BlockSpec((n_tokens, c1), const2)]
    if has_conv:
        in_specs += [pl.BlockSpec((c1, c2), const2),
                     pl.BlockSpec((1, c2), const2)]
    in_specs += [
        pl.BlockSpec((c2, c2), const2),                                   # lin_w
        pl.BlockSpec((1, c2), const2),                                    # lin_b
        pl.BlockSpec((None, c2, 3 * c2), lambda l: (l, 0, 0)),            # Wqkv (per layer)
        pl.BlockSpec((None, 1, 3 * c2), lambda l: (l, 0, 0)),             # bqkv
        pl.BlockSpec((None, num_heads, head_dim, c2), lambda l: (l, 0, 0, 0)),  # Wo rows
        pl.BlockSpec((None, 1, c2), lambda l: (l, 0, 0)),                 # bo
        pl.BlockSpec((None, c2, c2), lambda l: (l, 0, 0)),                # Wfc_eff
    ]

    out_tokens = pl.pallas_call(
        kernel,
        out_shape=jax.ShapeDtypeStruct((n_tokens, c2), jnp.float32),
        grid=(num_layers,),
        in_specs=in_specs,
        # Constant block index across the layer axis => activations stay VMEM-resident
        # (the output block is the layer-to-layer carry).
        out_specs=pl.BlockSpec((n_tokens, c2), const2),
        compiler_params=pltpu.CompilerParams(
            dimension_semantics=("arbitrary",)),   # layer axis is a sequential dependence
    )(tokens, *prepared_args)

    # (B*S, C) tokens -> NCHW
    return jnp.transpose(out_tokens.reshape(b, s, c2), (0, 2, 1)).reshape(b, c2, w, h)


class TransformerBlock:
    """JAX/Pallas equivalent of the PyTorch TransformerBlock (inference forward)."""

    def __init__(self, c1, c2, num_heads, num_layers, key):
        assert c2 % num_heads == 0
        self.c1, self.c2 = c1, c2
        self.num_heads = num_heads
        self.num_layers = num_layers
        self.has_conv = c1 != c2

        std = c2 ** -0.5
        keys = iter(jax.random.split(key, 16 + 9 * num_layers))
        params = {}
        if self.has_conv:
            params['conv_w'] = jax.random.normal(next(keys), (c2, c1), jnp.float32) * (c1 ** -0.5)
            params['bn_gamma'] = jax.random.uniform(next(keys), (c2,), jnp.float32,
                                                    minval=0.5, maxval=1.5)
            params['bn_beta'] = jax.random.normal(next(keys), (c2,), jnp.float32) * 0.1
            params['bn_mean'] = jax.random.normal(next(keys), (c2,), jnp.float32) * 0.1
            params['bn_var'] = jax.random.uniform(next(keys), (c2,), jnp.float32,
                                                  minval=0.5, maxval=1.5)
        params['lin_w'] = jax.random.normal(next(keys), (c2, c2), jnp.float32) * std
        params['lin_b'] = jax.random.normal(next(keys), (c2,), jnp.float32) * 0.02
        layers = []
        for _ in range(num_layers):
            layers.append({
                'wq': jax.random.normal(next(keys), (c2, c2), jnp.float32) * std,
                'wk': jax.random.normal(next(keys), (c2, c2), jnp.float32) * std,
                'wv': jax.random.normal(next(keys), (c2, c2), jnp.float32) * std,
                'w_in': jax.random.normal(next(keys), (3 * c2, c2), jnp.float32) * std,
                'b_in': jax.random.normal(next(keys), (3 * c2,), jnp.float32) * 0.02,
                'wo': jax.random.normal(next(keys), (c2, c2), jnp.float32) * std,
                'bo': jax.random.normal(next(keys), (c2,), jnp.float32) * 0.02,
                'wfc1': jax.random.normal(next(keys), (c2, c2), jnp.float32) * std,
                'wfc2': jax.random.normal(next(keys), (c2, c2), jnp.float32) * std,
            })
        params['layers'] = layers
        self.params = params
        # One-time weight prep (BN fusion, transposes, pre-multiplies, stacking, bf16 cast).
        self._args = self._prepare_kernel_args()

    def _prepare_kernel_args(self):
        p = self.params
        c2, H = self.c2, self.num_heads
        D = c2 // H
        scale = 1.0 / math.sqrt(D)
        args = []
        if self.has_conv:
            eps = 1e-5
            bn_scale = p['bn_gamma'] / jnp.sqrt(p['bn_var'] + eps)
            conv_w_eff = (p['conv_w'] * bn_scale[:, None]).T                   # (c1, c2)
            conv_b_eff = (p['bn_beta'] - p['bn_mean'] * bn_scale).reshape(1, c2)
            args += [conv_w_eff.astype(jnp.bfloat16), conv_b_eff.astype(jnp.float32)]
        args += [p['lin_w'].T.astype(jnp.bfloat16),
                 p['lin_b'].reshape(1, c2).astype(jnp.float32)]

        wqkv_l, bqkv_l, wo_l, bo_l, wf_l = [], [], [], [], []
        for lp in p['layers']:
            wiq, wik, wiv = lp['w_in'][:c2], lp['w_in'][c2:2 * c2], lp['w_in'][2 * c2:]
            biq, bik, biv = lp['b_in'][:c2], lp['b_in'][c2:2 * c2], lp['b_in'][2 * c2:]
            # Exact pre-multiplication of the chained bias-free linears (f32), scale folded
            # into the q path so the kernel never multiplies the score tensor.
            wq_eff = (lp['wq'].T @ wiq.T) * scale
            wk_eff = lp['wk'].T @ wik.T
            wv_eff = lp['wv'].T @ wiv.T
            wqkv_l.append(jnp.concatenate([wq_eff, wk_eff, wv_eff], axis=1))   # (c2, 3c2)
            bqkv_l.append(jnp.concatenate([biq * scale, bik, biv]).reshape(1, 3 * c2))
            wo_l.append(lp['wo'].T.reshape(H, D, c2))                          # per-head rows
            bo_l.append(lp['bo'].reshape(1, c2))
            wf_l.append(lp['wfc1'].T @ lp['wfc2'].T)                           # fc2(fc1(.)) fused
        args += [jnp.stack(wqkv_l).astype(jnp.bfloat16),
                 jnp.stack(bqkv_l).astype(jnp.float32),
                 jnp.stack(wo_l).astype(jnp.bfloat16),
                 jnp.stack(bo_l).astype(jnp.float32),
                 jnp.stack(wf_l).astype(jnp.bfloat16)]
        return args

    def __call__(self, x):
        return transformer_block_forward(
            x, self._args, c2=self.c2, num_heads=self.num_heads,
            num_layers=self.num_layers, has_conv=self.has_conv)


def transformer_block_reference(x, params, c2, num_heads):
    """Pure-JAX f32 reference mirroring the PyTorch forward (for correctness check)."""
    b, c1, w, h = x.shape
    s = w * h
    p = jnp.transpose(x.reshape(b, c1, s), (0, 2, 1)).astype(jnp.float32)   # (B, S, C1)
    if 'conv_w' in params:
        eps = 1e-5
        bn_scale = params['bn_gamma'] / jnp.sqrt(params['bn_var'] + eps)
        w_eff = params['conv_w'] * bn_scale[:, None]
        b_eff = params['bn_beta'] - params['bn_mean'] * bn_scale
        p = jnp.maximum(p @ w_eff.T + b_eff, 0.0)
    xx = p + (p @ params['lin_w'].T + params['lin_b'])
    d = c2 // num_heads
    for lp in params['layers']:
        q = xx @ lp['wq'].T
        k = xx @ lp['wk'].T
        v = xx @ lp['wv'].T
        q = q @ lp['w_in'][:c2].T + lp['b_in'][:c2]
        k = k @ lp['w_in'][c2:2 * c2].T + lp['b_in'][c2:2 * c2]
        v = v @ lp['w_in'][2 * c2:].T + lp['b_in'][2 * c2:]
        q = q.reshape(b, s, num_heads, d).transpose(0, 2, 1, 3)
        k = k.reshape(b, s, num_heads, d).transpose(0, 2, 1, 3)
        v = v.reshape(b, s, num_heads, d).transpose(0, 2, 1, 3)
        sc = jnp.einsum('bhqd,bhkd->bhqk', q, k) / math.sqrt(d)
        a = jax.nn.softmax(sc, axis=-1)
        o = jnp.einsum('bhqk,bhkd->bhqd', a, v).transpose(0, 2, 1, 3).reshape(b, s, c2)
        o = o @ lp['wo'].T + lp['bo']
        xx = xx + o
        xx = xx + (xx @ lp['wfc1'].T) @ lp['wfc2'].T
    return jnp.transpose(xx, (0, 2, 1)).reshape(b, c2, w, h)


def _check(out, ref, name):
    # Kernel runs matmuls in bf16 (f32 accumulation) -> compare with a relative bound.
    err = float(jnp.max(jnp.abs(out - ref)))
    scale = float(jnp.max(jnp.abs(ref)))
    assert err <= 5e-2 * max(scale, 1.0), f"{name}: max abs err {err} (ref max {scale})"


if __name__ == "__main__":
    key = jax.random.PRNGKey(0)
    k_p1, k_x1, k_p2, k_x2 = jax.random.split(key, 4)

    # Case 1: c1 == c2 (no conv). B=2, C=128 (lane-dense), 4x4 spatial -> seq=16, 2 layers.
    B, C, W, H = 2, 128, 4, 4
    block = TransformerBlock(C, C, num_heads=4, num_layers=2, key=k_p1)
    x = jax.random.normal(k_x1, (B, C, W, H), dtype=jnp.float32)
    out = jax.block_until_ready(block(x))
    assert out.shape == (B, C, W, H)
    assert out.dtype == jnp.float32
    ref = transformer_block_reference(x, block.params, C, 4)
    _check(out, ref, "case1")

    # Case 2: c1 != c2 -> fused 1x1 Conv + BN + ReLU preamble inside the same kernel.
    block2 = TransformerBlock(64, 128, num_heads=4, num_layers=1, key=k_p2)
    x2 = jax.random.normal(k_x2, (2, 64, 4, 4), dtype=jnp.float32)
    out2 = jax.block_until_ready(block2(x2))
    assert out2.shape == (2, 128, 4, 4)
    ref2 = transformer_block_reference(x2, block2.params, 128, 4)
    _check(out2, ref2, "case2")

    print("KERNEL_OK")
</pallas_src>

<mosaic_0001>
module attributes {stable_mosaic.version = 11 : i64} {
  func.func @kernel(%arg0: i32, %arg1: memref<32x128xf32, #tpu.memory_space<vmem>>, %arg2: memref<128x128xbf16, #tpu.memory_space<vmem>>, %arg3: memref<1x128xf32, #tpu.memory_space<vmem>>, %arg4: memref<1x128x384xbf16, #tpu.memory_space<vmem>>, %arg5: memref<1x1x384xf32, #tpu.memory_space<vmem>>, %arg6: memref<1x4x32x128xbf16, #tpu.memory_space<vmem>>, %arg7: memref<1x1x128xf32, #tpu.memory_space<vmem>>, %arg8: memref<1x128x128xbf16, #tpu.memory_space<vmem>>, %arg9: memref<32x128xf32, #tpu.memory_space<vmem>>) attributes {dimension_semantics = [#tpu.dimension_semantics<arbitrary>], iteration_bounds = array<i64: 2>, scalar_prefetch = 0 : i64, scratch_operands = 0 : i64, tpu.core_type = #tpu.core_type<tc>, window_params = [{pipeline_mode = #tpu.pipeline_mode<synchronous>, transform_indices = @transform_0, window_bounds = array<i64: 32, 128>}, {pipeline_mode = #tpu.pipeline_mode<synchronous>, transform_indices = @transform_1, window_bounds = array<i64: 128, 128>}, {pipeline_mode = #tpu.pipeline_mode<synchronous>, transform_indices = @transform_2, window_bounds = array<i64: 1, 128>}, {transform_indices = @transform_3, window_bounds = array<i64: 1, 128, 384>}, {transform_indices = @transform_4, window_bounds = array<i64: 1, 1, 384>}, {transform_indices = @transform_5, window_bounds = array<i64: 1, 4, 32, 128>}, {transform_indices = @transform_6, window_bounds = array<i64: 1, 1, 128>}, {transform_indices = @transform_7, window_bounds = array<i64: 1, 128, 128>}, {pipeline_mode = #tpu.pipeline_mode<synchronous>, transform_indices = @transform_8, window_bounds = array<i64: 32, 128>}]} {
    %c0_i32 = arith.constant 0 : i32
    %0 = arith.cmpi eq, %arg0, %c0_i32 : i32
    %1 = arith.extui %0 : i1 to i32
    %c0_i32_0 = arith.constant 0 : i32
    %2 = arith.cmpi ne, %1, %c0_i32_0 : i32
    scf.if %2 {
      %c0_50 = arith.constant 0 : index
      %c0_51 = arith.constant 0 : index
      %119 = vector.load %arg1[%c0_50, %c0_51] : memref<32x128xf32, #tpu.memory_space<vmem>>, vector<32x128xf32>
      %120 = arith.truncf %119 : vector<32x128xf32> to vector<32x128xbf16>
      %c0_52 = arith.constant 0 : index
      %c0_53 = arith.constant 0 : index
      %121 = vector.load %arg2[%c0_52, %c0_53] : memref<128x128xbf16, #tpu.memory_space<vmem>>, vector<128x128xbf16>
      %cst_54 = arith.constant dense<0.000000e+00> : vector<32x128xf32>
      %122 = tpu.matmul %120, %121, %cst_54 {dimension_numbers = #tpu.dot_dimension_numbers<[1], [0], [0], [1], [0, 0, 1, 1], [], []>} : vector<32x128xbf16>, vector<128x128xbf16>, vector<32x128xf32> -> vector<32x128xf32>
      %c0_55 = arith.constant 0 : index
      %c0_56 = arith.constant 0 : index
      %123 = vector.load %arg3[%c0_55, %c0_56] : memref<1x128xf32, #tpu.memory_space<vmem>>, vector<1x128xf32>
      %124 = vector.broadcast %123 : vector<1x128xf32> to vector<32x128xf32>
      %125 = arith.addf %122, %124 : vector<32x128xf32>
      %126 = arith.addf %119, %125 : vector<32x128xf32>
      %c0_57 = arith.constant 0 : index
      %c0_58 = arith.constant 0 : index
      %127 = vector.load %arg9[%c0_57, %c0_58] : memref<32x128xf32, #tpu.memory_space<vmem>>, vector<32x128xf32>
      tpu.vector_store %arg9[%c0_57, %c0_58], %126 {strides = array<i32>} : memref<32x128xf32, #tpu.memory_space<vmem>>, vector<32x128xf32>,
    } else {
    }
    %c0 = arith.constant 0 : index
    %c0_1 = arith.constant 0 : index
    %3 = vector.load %arg9[%c0, %c0_1] : memref<32x128xf32, #tpu.memory_space<vmem>>, vector<32x128xf32>
    %4 = arith.truncf %3 : vector<32x128xf32> to vector<32x128xbf16>
    %c0_2 = arith.constant 0 : index
    %c0_3 = arith.constant 0 : index
    %c0_4 = arith.constant 0 : index
    %5 = vector.load %arg4[%c0_2, %c0_3, %c0_4] : memref<1x128x384xbf16, #tpu.memory_space<vmem>>, vector<1x128x384xbf16>
    %6 = vector.shape_cast %5 : vector<1x128x384xbf16> to vector<128x384xbf16>
    %cst = arith.constant dense<0.000000e+00> : vector<32x384xf32>
    %7 = tpu.matmul %4, %6, %cst {dimension_numbers = #tpu.dot_dimension_numbers<[1], [0], [0], [1], [0, 0, 1, 1], [], []>} : vector<32x128xbf16>, vector<128x384xbf16>, vector<32x384xf32> -> vector<32x384xf32>
    %c0_5 = arith.constant 0 : index
    %c0_6 = arith.constant 0 : index
    %c0_7 = arith.constant 0 : index
    %8 = vector.load %arg5[%c0_5, %c0_6, %c0_7] : memref<1x1x384xf32, #tpu.memory_space<vmem>>, vector<1x1x384xf32>
    %9 = vector.shape_cast %8 : vector<1x1x384xf32> to vector<1x384xf32>
    %10 = vector.broadcast %9 : vector<1x384xf32> to vector<32x384xf32>
    %11 = arith.addf %7, %10 : vector<32x384xf32>
    %12 = vector.extract_strided_slice %11 {offsets = [0, 0], sizes = [32, 128], strides = [1, 1]} : vector<32x384xf32> to vector<32x128xf32>
    %13 = vector.shape_cast %12 : vector<32x128xf32> to vector<2x16x128xf32>
    %14 = arith.truncf %13 : vector<2x16x128xf32> to vector<2x16x128xbf16>
    %15 = vector.extract_strided_slice %11 {offsets = [0, 128], sizes = [32, 128], strides = [1, 1]} : vector<32x384xf32> to vector<32x128xf32>
    %16 = vector.shape_cast %15 : vector<32x128xf32> to vector<2x16x128xf32>
    %17 = arith.truncf %16 : vector<2x16x128xf32> to vector<2x16x128xbf16>
    %18 = vector.extract_strided_slice %11 {offsets = [0, 256], sizes = [32, 128], strides = [1, 1]} : vector<32x384xf32> to vector<32x128xf32>
    %19 = vector.shape_cast %18 : vector<32x128xf32> to vector<2x16x128xf32>
    %20 = arith.truncf %19 : vector<2x16x128xf32> to vector<2x16x128xbf16>
    %21 = vector.extract_strided_slice %14 {offsets = [0, 0, 0], sizes = [2, 16, 32], strides = [1, 1, 1]} : vector<2x16x128xbf16> to vector<2x16x32xbf16>
    %22 = vector.extract_strided_slice %17 {offsets = [0, 0, 0], sizes = [2, 16, 32], strides = [1, 1, 1]} : vector<2x16x128xbf16> to vector<2x16x32xbf16>
    %23 = vector.extract_strided_slice %20 {offsets = [0, 0, 0], sizes = [2, 16, 32], strides = [1, 1, 1]} : vector<2x16x128xbf16> to vector<2x16x32xbf16>
    "tpu.trace_start"() <{level = 10 : i32, message = "bqd,bkd->bqk"}> : () -> ()
    %cst_8 = arith.constant dense<0.000000e+00> : vector<2x16x16xf32>
    %24 = tpu.matmul %21, %22, %cst_8 {dimension_numbers = #tpu.dot_dimension_numbers<[2], [2], [1], [1], [0, 0, 0, 1, 1, 1], [0], [0]>} : vector<2x16x32xbf16>, vector<2x16x32xbf16>, vector<2x16x16xf32> -> vector<2x16x16xf32>
    "tpu.trace_stop"() : () -> ()
    %cst_9 = arith.constant dense<0xFF800000> : vector<2x16xf32>
    %25 = vector.multi_reduction <maximumf>, %24, %cst_9 [2] : vector<2x16x16xf32> to vector<2x16xf32>
    %26 = vector.shape_cast %25 : vector<2x16xf32> to vector<2x16x1xf32>
    %27 = vector.broadcast %26 : vector<2x16x1xf32> to vector<2x16x16xf32>
    %28 = arith.subf %24, %27 : vector<2x16x16xf32>
    %29 = math.exp %28 : vector<2x16x16xf32>
    %cst_10 = arith.constant dense<0.000000e+00> : vector<2x16xf32>
    %30 = vector.multi_reduction <add>, %29, %cst_10 [2] : vector<2x16x16xf32> to vector<2x16xf32>
    %31 = vector.shape_cast %30 : vector<2x16xf32> to vector<2x16x1xf32>
    %32 = arith.truncf %29 : vector<2x16x16xf32> to vector<2x16x16xbf16>
    "tpu.trace_start"() <{level = 10 : i32, message = "bqk,bkd->bqd"}> : () -> ()
    %cst_11 = arith.constant dense<0.000000e+00> : vector<2x16x32xf32>
    %33 = tpu.matmul %32, %23, %cst_11 {dimension_numbers = #tpu.dot_dimension_numbers<[2], [1], [1], [2], [0, 0, 0, 1, 1, 2], [0], [0]>} : vector<2x16x16xbf16>, vector<2x16x32xbf16>, vector<2x16x32xf32> -> vector<2x16x32xf32>
    "tpu.trace_stop"() : () -> ()
    %34 = tpu.reciprocal %31 {approx = true} : vector<2x16x1xf32> -> vector<2x16x1xf32>
    %35 = vector.broadcast %34 : vector<2x16x1xf32> to vector<2x16x32xf32>
    %36 = arith.mulf %33, %35 : vector<2x16x32xf32>
    %37 = vector.shape_cast %36 : vector<2x16x32xf32> to vector<32x32xf32>
    %38 = arith.truncf %37 : vector<32x32xf32> to vector<32x32xbf16>
    %c0_12 = arith.constant 0 : index
    %c0_13 = arith.constant 0 : index
    %c0_14 = arith.constant 0 : index
    %c0_15 = arith.constant 0 : index
    %39 = vector.load %arg6[%c0_12, %c0_13, %c0_14, %c0_15] : memref<1x4x32x128xbf16, #tpu.memory_space<vmem>>, vector<1x1x32x128xbf16>
    %40 = vector.shape_cast %39 : vector<1x1x32x128xbf16> to vector<32x128xbf16>
    %cst_16 = arith.constant dense<0.000000e+00> : vector<32x128xf32>
    %41 = tpu.matmul %38, %40, %cst_16 {dimension_numbers = #tpu.dot_dimension_numbers<[1], [0], [0], [1], [0, 0, 1, 1], [], []>} : vector<32x32xbf16>, vector<32x128xbf16>, vector<32x128xf32> -> vector<32x128xf32>
    %42 = vector.extract_strided_slice %14 {offsets = [0, 0, 32], sizes = [2, 16, 32], strides = [1, 1, 1]} : vector<2x16x128xbf16> to vector<2x16x32xbf16>
    %43 = vector.extract_strided_slice %17 {offsets = [0, 0, 32], sizes = [2, 16, 32], strides = [1, 1, 1]} : vector<2x16x128xbf16> to vector<2x16x32xbf16>
    %44 = vector.extract_strided_slice %20 {offsets = [0, 0, 32], sizes = [2, 16, 32], strides = [1, 1, 1]} : vector<2x16x128xbf16> to vector<2x16x32xbf16>
    "tpu.trace_start"() <{level = 10 : i32, message = "bqd,bkd->bqk"}> : () -> ()
    %cst_17 = arith.constant dense<0.000000e+00> : vector<2x16x16xf32>
    %45 = tpu.matmul %42, %43, %cst_17 {dimension_numbers = #tpu.dot_dimension_numbers<[2], [2], [1], [1], [0, 0, 0, 1, 1, 1], [0], [0]>} : vector<2x16x32xbf16>, vector<2x16x32xbf16>, vector<2x16x16xf32> -> vector<2x16x16xf32>
    "tpu.trace_stop"() : () -> ()
    %cst_18 = arith.constant dense<0xFF800000> : vector<2x16xf32>
    %46 = vector.multi_reduction <maximumf>, %45, %cst_18 [2] : vector<2x16x16xf32> to vector<2x16xf32>
    %47 = vector.shape_cast %46 : vector<2x16xf32> to vector<2x16x1xf32>
    %48 = vector.broadcast %47 : vector<2x16x1xf32> to vector<2x16x16xf32>
    %49 = arith.subf %45, %48 : vector<2x16x16xf32>
    %50 = math.exp %49 : vector<2x16x16xf32>
    %cst_19 = arith.constant dense<0.000000e+00> : vector<2x16xf32>
    %51 = vector.multi_reduction <add>, %50, %cst_19 [2] : vector<2x16x16xf32> to vector<2x16xf32>
    %52 = vector.shape_cast %51 : vector<2x16xf32> to vector<2x16x1xf32>
    %53 = arith.truncf %50 : vector<2x16x16xf32> to vector<2x16x16xbf16>
    "tpu.trace_start"() <{level = 10 : i32, message = "bqk,bkd->bqd"}> : () -> ()
    %cst_20 = arith.constant dense<0.000000e+00> : vector<2x16x32xf32>
    %54 = tpu.matmul %53, %44, %cst_20 {dimension_numbers = #tpu.dot_dimension_numbers<[2], [1], [1], [2], [0, 0, 0, 1, 1, 2], [0], [0]>} : vector<2x16x16xbf16>, vector<2x16x32xbf16>, vector<2x16x32xf32> -> vector<2x16x32xf32>
    "tpu.trace_stop"() : () -> ()
    %55 = tpu.reciprocal %52 {approx = true} : vector<2x16x1xf32> -> vector<2x16x1xf32>
    %56 = vector.broadcast %55 : vector<2x16x1xf32> to vector<2x16x32xf32>
    %57 = arith.mulf %54, %56 : vector<2x16x32xf32>
    %58 = vector.shape_cast %57 : vector<2x16x32xf32> to vector<32x32xf32>
    %59 = arith.truncf %58 : vector<32x32xf32> to vector<32x32xbf16>
    %c0_21 = arith.constant 0 : index
    %c1 = arith.constant 1 : index
    %c0_22 = arith.constant 0 : index
    %c0_23 = arith.constant 0 : index
    %60 = vector.load %arg6[%c0_21, %c1, %c0_22, %c0_23] : memref<1x4x32x128xbf16, #tpu.memory_space<vmem>>, vector<1x1x32x128xbf16>
    %61 = vector.shape_cast %60 : vector<1x1x32x128xbf16> to vector<32x128xbf16>
    %cst_24 = arith.constant dense<0.000000e+00> : vector<32x128xf32>
    %62 = tpu.matmul %59, %61, %cst_24 {dimension_numbers = #tpu.dot_dimension_numbers<[1], [0], [0], [1], [0, 0, 1, 1], [], []>} : vector<32x32xbf16>, vector<32x128xbf16>, vector<32x128xf32> -> vector<32x128xf32>
    %63 = arith.addf %41, %62 : vector<32x128xf32>
    %64 = vector.extract_strided_slice %14 {offsets = [0, 0, 64], sizes = [2, 16, 32], strides = [1, 1, 1]} : vector<2x16x128xbf16> to vector<2x16x32xbf16>
    %65 = vector.extract_strided_slice %17 {offsets = [0, 0, 64], sizes = [2, 16, 32], strides = [1, 1, 1]} : vector<2x16x128xbf16> to vector<2x16x32xbf16>
    %66 = vector.extract_strided_slice %20 {offsets = [0, 0, 64], sizes = [2, 16, 32], strides = [1, 1, 1]} : vector<2x16x128xbf16> to vector<2x16x32xbf16>
    "tpu.trace_start"() <{level = 10 : i32, message = "bqd,bkd->bqk"}> : () -> ()
    %cst_25 = arith.constant dense<0.000000e+00> : vector<2x16x16xf32>
    %67 = tpu.matmul %64, %65, %cst_25 {dimension_numbers = #tpu.dot_dimension_numbers<[2], [2], [1], [1], [0, 0, 0, 1, 1, 1], [0], [0]>} : vector<2x16x32xbf16>, vector<2x16x32xbf16>, vector<2x16x16xf32> -> vector<2x16x16xf32>
    "tpu.trace_stop"() : () -> ()
    %cst_26 = arith.constant dense<0xFF800000> : vector<2x16xf32>
    %68 = vector.multi_reduction <maximumf>, %67, %cst_26 [2] : vector<2x16x16xf32> to vector<2x16xf32>
    %69 = vector.shape_cast %68 : vector<2x16xf32> to vector<2x16x1xf32>
    %70 = vector.broadcast %69 : vector<2x16x1xf32> to vector<2x16x16xf32>
    %71 = arith.subf %67, %70 : vector<2x16x16xf32>
    %72 = math.exp %71 : vector<2x16x16xf32>
    %cst_27 = arith.constant dense<0.000000e+00> : vector<2x16xf32>
    %73 = vector.multi_reduction <add>, %72, %cst_27 [2] : vector<2x16x16xf32> to vector<2x16xf32>
    %74 = vector.shape_cast %73 : vector<2x16xf32> to vector<2x16x1xf32>
    %75 = arith.truncf %72 : vector<2x16x16xf32> to vector<2x16x16xbf16>
    "tpu.trace_start"() <{level = 10 : i32, message = "bqk,bkd->bqd"}> : () -> ()
    %cst_28 = arith.constant dense<0.000000e+00> : vector<2x16x32xf32>
    %76 = tpu.matmul %75, %66, %cst_28 {dimension_numbers = #tpu.dot_dimension_numbers<[2], [1], [1], [2], [0, 0, 0, 1, 1, 2], [0], [0]>} : vector<2x16x16xbf16>, vector<2x16x32xbf16>, vector<2x16x32xf32> -> vector<2x16x32xf32>
    "tpu.trace_stop"() : () -> ()
    %77 = tpu.reciprocal %74 {approx = true} : vector<2x16x1xf32> -> vector<2x16x1xf32>
    %78 = vector.broadcast %77 : vector<2x16x1xf32> to vector<2x16x32xf32>
    %79 = arith.mulf %76, %78 : vector<2x16x32xf32>
    %80 = vector.shape_cast %79 : vector<2x16x32xf32> to vector<32x32xf32>
    %81 = arith.truncf %80 : vector<32x32xf32> to vector<32x32xbf16>
    %c0_29 = arith.constant 0 : index
    %c2 = arith.constant 2 : index
    %c0_30 = arith.constant 0 : index
    %c0_31 = arith.constant 0 : index
    %82 = vector.load %arg6[%c0_29, %c2, %c0_30, %c0_31] : memref<1x4x32x128xbf16, #tpu.memory_space<vmem>>, vector<1x1x32x128xbf16>
    %83 = vector.shape_cast %82 : vector<1x1x32x128xbf16> to vector<32x128xbf16>
    %cst_32 = arith.constant dense<0.000000e+00> : vector<32x128xf32>
    %84 = tpu.matmul %81, %83, %cst_32 {dimension_numbers = #tpu.dot_dimension_numbers<[1], [0], [0], [1], [0, 0, 1, 1], [], []>} : vector<32x32xbf16>, vector<32x128xbf16>, vector<32x128xf32> -> vector<32x128xf32>
    %85 = arith.addf %63, %84 : vector<32x128xf32>
    %86 = vector.extract_strided_slice %14 {offsets = [0, 0, 96], sizes = [2, 16, 32], strides = [1, 1, 1]} : vector<2x16x128xbf16> to vector<2x16x32xbf16>
    %87 = vector.extract_strided_slice %17 {offsets = [0, 0, 96], sizes = [2, 16, 32], strides = [1, 1, 1]} : vector<2x16x128xbf16> to vector<2x16x32xbf16>
    %88 = vector.extract_strided_slice %20 {offsets = [0, 0, 96], sizes = [2, 16, 32], strides = [1, 1, 1]} : vector<2x16x128xbf16> to vector<2x16x32xbf16>
    "tpu.trace_start"() <{level = 10 : i32, message = "bqd,bkd->bqk"}> : () -> ()
    %cst_33 = arith.constant dense<0.000000e+00> : vector<2x16x16xf32>
    %89 = tpu.matmul %86, %87, %cst_33 {dimension_numbers = #tpu.dot_dimension_numbers<[2], [2], [1], [1], [0, 0, 0, 1, 1, 1], [0], [0]>} : vector<2x16x32xbf16>, vector<2x16x32xbf16>, vector<2x16x16xf32> -> vector<2x16x16xf32>
    "tpu.trace_stop"() : () -> ()
    %cst_34 = arith.constant dense<0xFF800000> : vector<2x16xf32>
    %90 = vector.multi_reduction <maximumf>, %89, %cst_34 [2] : vector<2x16x16xf32> to vector<2x16xf32>
    %91 = vector.shape_cast %90 : vector<2x16xf32> to vector<2x16x1xf32>
    %92 = vector.broadcast %91 : vector<2x16x1xf32> to vector<2x16x16xf32>
    %93 = arith.subf %89, %92 : vector<2x16x16xf32>
    %94 = math.exp %93 : vector<2x16x16xf32>
    %cst_35 = arith.constant dense<0.000000e+00> : vector<2x16xf32>
    %95 = vector.multi_reduction <add>, %94, %cst_35 [2] : vector<2x16x16xf32> to vector<2x16xf32>
    %96 = vector.shape_cast %95 : vector<2x16xf32> to vector<2x16x1xf32>
    %97 = arith.truncf %94 : vector<2x16x16xf32> to vector<2x16x16xbf16>
    "tpu.trace_start"() <{level = 10 : i32, message = "bqk,bkd->bqd"}> : () -> ()
    %cst_36 = arith.constant dense<0.000000e+00> : vector<2x16x32xf32>
    %98 = tpu.matmul %97, %88, %cst_36 {dimension_numbers = #tpu.dot_dimension_numbers<[2], [1], [1], [2], [0, 0, 0, 1, 1, 2], [0], [0]>} : vector<2x16x16xbf16>, vector<2x16x32xbf16>, vector<2x16x32xf32> -> vector<2x16x32xf32>
    "tpu.trace_stop"() : () -> ()
    %99 = tpu.reciprocal %96 {approx = true} : vector<2x16x1xf32> -> vector<2x16x1xf32>
    %100 = vector.broadcast %99 : vector<2x16x1xf32> to vector<2x16x32xf32>
    %101 = arith.mulf %98, %100 : vector<2x16x32xf32>
    %102 = vector.shape_cast %101 : vector<2x16x32xf32> to vector<32x32xf32>
    %103 = arith.truncf %102 : vector<32x32xf32> to vector<32x32xbf16>
    %c0_37 = arith.constant 0 : index
    %c3 = arith.constant 3 : index
    %c0_38 = arith.constant 0 : index
    %c0_39 = arith.constant 0 : index
    %104 = vector.load %arg6[%c0_37, %c3, %c0_38, %c0_39] : memref<1x4x32x128xbf16, #tpu.memory_space<vmem>>, vector<1x1x32x128xbf16>
    %105 = vector.shape_cast %104 : vector<1x1x32x128xbf16> to vector<32x128xbf16>
    %cst_40 = arith.constant dense<0.000000e+00> : vector<32x128xf32>
    %106 = tpu.matmul %103, %105, %cst_40 {dimension_numbers = #tpu.dot_dimension_numbers<[1], [0], [0], [1], [0, 0, 1, 1], [], []>} : vector<32x32xbf16>, vector<32x128xbf16>, vector<32x128xf32> -> vector<32x128xf32>
    %107 = arith.addf %85, %106 : vector<32x128xf32>
    %108 = arith.addf %3, %107 : vector<32x128xf32>
    %c0_41 = arith.constant 0 : index
    %c0_42 = arith.constant 0 : index
    %c0_43 = arith.constant 0 : index
    %109 = vector.load %arg7[%c0_41, %c0_42, %c0_43] : memref<1x1x128xf32, #tpu.memory_space<vmem>>, vector<1x1x128xf32>
    %110 = vector.shape_cast %109 : vector<1x1x128xf32> to vector<1x128xf32>
    %111 = vector.broadcast %110 : vector<1x128xf32> to vector<32x128xf32>
    %112 = arith.addf %108, %111 : vector<32x128xf32>
    %113 = arith.truncf %112 : vector<32x128xf32> to vector<32x128xbf16>
    %c0_44 = arith.constant 0 : index
    %c0_45 = arith.constant 0 : index
    %c0_46 = arith.constant 0 : index
    %114 = vector.load %arg8[%c0_44, %c0_45, %c0_46] : memref<1x128x128xbf16, #tpu.memory_space<vmem>>, vector<1x128x128xbf16>
    %115 = vector.shape_cast %114 : vector<1x128x128xbf16> to vector<128x128xbf16>
    %cst_47 = arith.constant dense<0.000000e+00> : vector<32x128xf32>
    %116 = tpu.matmul %113, %115, %cst_47 {dimension_numbers = #tpu.dot_dimension_numbers<[1], [0], [0], [1], [0, 0, 1, 1], [], []>} : vector<32x128xbf16>, vector<128x128xbf16>, vector<32x128xf32> -> vector<32x128xf32>
    %117 = arith.addf %112, %116 : vector<32x128xf32>
    %c0_48 = arith.constant 0 : index
    %c0_49 = arith.constant 0 : index
    %118 = vector.load %arg9[%c0_48, %c0_49] : memref<32x128xf32, #tpu.memory_space<vmem>>, vector<32x128xf32>
    tpu.vector_store %arg9[%c0_48, %c0_49], %117 {strides = array<i32>} : memref<32x128xf32, #tpu.memory_space<vmem>>, vector<32x128xf32>,
    return
  }
  func.func @transform_0(%arg0: i32) -> (i32, i32) {
    %c0_i32 = arith.constant 0 : i32
    %c0_i32_0 = arith.constant 0 : i32
    %c0_i32_1 = arith.constant 0 : i32
    return %c0_i32, %c0_i32_0 : i32, i32
  }
  func.func @transform_1(%arg0: i32) -> (i32, i32) {
    %c0_i32 = arith.constant 0 : i32
    %c0_i32_0 = arith.constant 0 : i32
    %c0_i32_1 = arith.constant 0 : i32
    return %c0_i32, %c0_i32_0 : i32, i32
  }
  func.func @transform_2(%arg0: i32) -> (i32, i32) {
    %c0_i32 = arith.constant 0 : i32
    %c0_i32_0 = arith.constant 0 : i32
    %c0_i32_1 = arith.constant 0 : i32
    return %c0_i32, %c0_i32_0 : i32, i32
  }
  func.func @transform_3(%arg0: i32) -> (i32, i32, i32) {
    %c0_i32 = arith.constant 0 : i32
    %c0_i32_0 = arith.constant 0 : i32
    %c0_i32_1 = arith.constant 0 : i32
    return %arg0, %c0_i32, %c0_i32_0 : i32, i32, i32
  }
  func.func @transform_4(%arg0: i32) -> (i32, i32, i32) {
    %c0_i32 = arith.constant 0 : i32
    %c0_i32_0 = arith.constant 0 : i32
    %c0_i32_1 = arith.constant 0 : i32
    return %arg0, %c0_i32, %c0_i32_0 : i32, i32, i32
  }
  func.func @transform_5(%arg0: i32) -> (i32, i32, i32, i32) {
    %c0_i32 = arith.constant 0 : i32
    %c0_i32_0 = arith.constant 0 : i32
    %c0_i32_1 = arith.constant 0 : i32
    %c0_i32_2 = arith.constant 0 : i32
    return %arg0, %c0_i32, %c0_i32_0, %c0_i32_1 : i32, i32, i32, i32
  }
  func.func @transform_6(%arg0: i32) -> (i32, i32, i32) {
    %c0_i32 = arith.constant 0 : i32
    %c0_i32_0 = arith.constant 0 : i32
    %c0_i32_1 = arith.constant 0 : i32
    return %arg0, %c0_i32, %c0_i32_0 : i32, i32, i32
  }
  func.func @transform_7(%arg0: i32) -> (i32, i32, i32) {
    %c0_i32 = arith.constant 0 : i32
    %c0_i32_0 = arith.constant 0 : i32
    %c0_i32_1 = arith.constant 0 : i32
    return %arg0, %c0_i32, %c0_i32_0 : i32, i32, i32
  }
  func.func @transform_8(%arg0: i32) -> (i32, i32) {
    %c0_i32 = arith.constant 0 : i32
    %c0_i32_0 = arith.constant 0 : i32
    %c0_i32_1 = arith.constant 0 : i32
    return %c0_i32, %c0_i32_0 : i32, i32
  }
}

</mosaic_0001>

<bundles_post_ra>
// kernel: tpu_custom_call.1
= control target key start
LH: loop header
LB: loop body
LE: loop exit
PB: predicated region body
PF: predicated region fallthrough
CT: control target
= control target key end

     0   :  { %s3126_s0 = inlined_call_operand.hbm [shape: f32[32,128], index: 0, kind: input, shape index: {}]   ;;  %s3127_s1 = inlined_call_operand.hbm [shape: bf16[128,128], index: 1, kind: input, shape index: {}]   ;;  %s3128_s2 = inlined_call_operand.vmem [shape: f32[1,128], index: 2, kind: input, shape index: {}]   ;;  %s3129_s3 = inlined_call_operand.hbm [shape: bf16[2,128,384], index: 3, kind: input, shape index: {}]   ;;  %s3130_s4 = inlined_call_operand.hbm [shape: f32[2,1,384], index: 4, kind: input, shape index: {}]   ;;  %s3131_s5 = inlined_call_operand.hbm [shape: bf16[2,4,32,128], index: 5, kind: input, shape index: {}]   ;;  %s3132_s6 = inlined_call_operand.vmem [shape: f32[2,1,128], index: 6, kind: input, shape index: {}]   ;;  %s3133_s7 = inlined_call_operand.hbm [shape: bf16[2,128,128], index: 7, kind: input, shape index: {}]   ;;  %s3134_s8 = inlined_call_operand.hbm [shape: f32[32,128], index: 8, kind: output, shape index: {}]  }
   0x1   :  { %3138 = sst [smem:[#allocation19_spill]] %s3126_s0 }
   0x2   :  { %3139 = sst [smem:[#allocation20_spill]] %s3127_s1 }
   0x3   :  { %3140 = sst [smem:[#allocation21_spill]] %s3129_s3 }
   0x4   :  { %13 = vsyncpa [#allocation3], 0 }
   0x5   :  { %14 = vsyncpa [#allocation6], 0 }
   0x6   :  { %15 = vsyncpa [#allocation4], 0  ;;  %s2655_s27 = smov 0   ;;  %s2657_s28 = smov 0  }
   0x7   :  { %s2659_s29 = smov 0   ;;  %s2661_s30 = smov 0  }
   0x8 LB: > { %3141 = sst [smem:[#allocation16_spill]] %s2590_s29  ;;  %s2674_s9 = sadd.s32 4294967295, %s2594_s30   ;;  %s2594_s30 = sphi %s2661_s30, %s3151_s30   ;;  %s2590_s29 = sphi %s2659_s29, %s3153_s29   ;;  %s2586_s28 = sphi %s2657_s28, %s3155_s28   ;;  %s2582_s27 = sphi %s2655_s27, %s3154_s27  }
   0x9   : > { %p104_p0 = scmp.ne.s32.totalorder %s2586_s28, %s2582_s27  ;;  %p105_p1 = scmp.eq.s32.totalorder %s2674_s9, 0 }
   0xa   : > { %p1864_p2 = scmp.ge.s32.totalorder %s2594_s30, 1  ;;  %p240_p3 = scmp.lt.s32.totalorder %s2594_s30, 3 }
   0xb   : > { %p1865_p4 = scmp.ne.s32.totalorder %s2674_s9, 0  ;;  %p2683_p5 = por %p105_p1, %p104_p0 }
   0xc   : > { %s3143_s0 = sld [smem:[#allocation19_spill]]  ;;  %p2690_p6 = pnand %p1864_p2, %p240_p3 }
   0xd   : > { %s2596_s15 = smov [#allocation2]   ;;  %s2703_s18 = sadd.s32 1, %s2594_s30  }
   0xe   : > { %p2197_p7 = pneg %p2690_p6  ;;  %s253_s16 = sshll.u32 %s2596_s15, 4  ;;  %s254_s16 = int_to_ptr.vmem [resolvable:$true] %s253_s16 }
   0xf   : > { %3146 = sst [smem:[#allocation17_spill]] %s2703_s18  ;;  %s2597_s19 = smov 128  }
  0x10   : > { %p2698_p8 = pnand %p2197_p7, %p105_p1  ;;  %s2598_s20 = smov 8  }
  0x11   : > { %s88_s21 = ssub.s32 %s2594_s30, %s2703_s18  ;;  %s91_s22 = sadd.s32 1, %s2590_s29 }
  0x12   : > { %s251_s13 = sshll.u32 %s3143_s0, 4  ;;  %p89_p9 = scmp.eq.s32.totalorder %s88_s21, 0  ;;  %s252_s13 = int_to_ptr.hbm [resolvable:$true] %s251_s13 }
  0x13   : > { %2200 = dma.hbm_to_vmem [thread:$0]  (!%p2698_p8), %s252_s13, 512, %s254_s16, [#allocation3], %s2597_s19, %s2597_s19, %s2598_s20  }
  0x14   : > { %p98_p10 = scmp.ne.s32.totalorder %s2590_s29, %s2586_s28  ;;  %p99_p11 = scmp.eq.s32.totalorder %s2594_s30, 0 }
  0x15   : > { %p2219_p12 = scmp.lt.s32.totalorder %s2594_s30, 2  ;;  %s284_s24 = sand.u32 1, %s2594_s30  }
  0x16   : > { %s2715_s23 = scalar_select %p89_p9, %s2590_s29, %s91_s22  }
  0x17   : > { %p100_p13 = por %p99_p11, %p98_p10  ;;  %s2719_s25 = sand.u32 1, %s2590_s29  }
  0x18   : > { %3147 = sst [smem:[#allocation18_spill]] %s2715_s23  ;;  %s2171_s26 = smul.u32 192, %s2719_s25 }
  0x19   : > { %p2722_p0 = pnand %p2219_p12, %p100_p13  ;;  %s2172_s11 = smul.u32 192, %s2594_s30 }
  0x1a   : > { %s3149_s3 = sld [smem:[#allocation21_spill]]  ;;  %s288_s16 = scalar_lea.vmem [#allocation7], %s2171_s26 }
  0x1b   : > { %s296_s19 = sshll.u32 %s288_s16, 4  ;;  %s2730_s21 = scalar_lea.sflag [#allocation3], %s284_s24  ;;  %s297_s19 = int_to_ptr.vmem [resolvable:$true] %s296_s19 }
  0x1c   : > { %p2374_p3 = pneg %p2722_p0 }
  0x20   : > { %s293_s15 = scalar_lea.hbm %s3149_s3, %s2172_s11  ;;  %s2377_s26 = scalar_lea.hbm %s3149_s3, 384 }
  0x21   : > { %s294_s20 = sshll.u32 %s293_s15, 4  ;;  %s295_s20 = int_to_ptr.hbm [resolvable:$true] %s294_s20 }
  0x22   : > { %s2370_s22 = sshra.s32 %s295_s20, 4  ;;  %s2371_s22 = int_to_ptr.hbm [resolvable:$true] %s2370_s22 }
  0x23   : > { %s2372_s0 = scalar_lea.hbm %s2371_s22, 192  ;;  %p2378_p10 = scmp.lt.s32.totalorder %s2371_s22, %s3149_s3 }
  0x24   : > { %p2373_p2 = scmp.ne.s32.totalorder %s2371_s22, %s2372_s0  ;;  %p2379_p11 = scmp.lt.s32.totalorder %s2377_s26, %s2372_s0 }
  0x26   : > { %p2375_p7 = pnand %p2374_p3, %p2373_p2  ;;  %p2380_p12 = por %p2379_p11, %p2378_p10 }
  0x28   : > { %p2376_p9 = pneg %p2375_p7 }
  0x2a   : > { %p2381_p13 = pnand %p2380_p12, %p2376_p9 }
  0x2c   : > { %2384 = shalt.err (!%p2381_p13)
}
  0x2d   : > { %s2599_s24 = smov 192   ;;  %s2600_s15 = smov 12  }
  0x2e   : > { %2207 = dma.hbm_to_vmem [thread:$0]  (!%p2722_p0), %s295_s20, 3072, %s297_s19, %s2730_s21, %s2599_s24, %s2599_s24, %s2600_s15  }
  0x2f   : > { %s2173_s23 = smul.u32 3, %s2719_s25  ;;  %s1869_s12 = sshll.u32 %s2719_s25, 6 }
  0x30   : > { %s2174_s16 = smul.u32 3, %s2594_s30  ;;  %s2407_s24 = scalar_lea.hbm %s3130_s4, 6 }
  0x31   : > { %s310_s22 = scalar_lea.vmem [#allocation8], %s2173_s23 }
  0x32   : > { %s314_s0 = scalar_lea.hbm %s3130_s4, %s2174_s16  ;;  %s318_s26 = sshll.u32 %s310_s22, 4  ;;  %s319_s26 = int_to_ptr.vmem [resolvable:$true] %s318_s26 }
  0x33   : > { %s316_s13 = sshll.u32 %s314_s0, 4  ;;  %s317_s13 = int_to_ptr.hbm [resolvable:$true] %s316_s13 }
  0x34   : > { %s2400_s3 = sshra.s32 %s317_s13, 4  ;;  %s2401_s3 = int_to_ptr.hbm [resolvable:$true] %s2400_s3 }
  0x35   : > { %s2402_s18 = scalar_lea.hbm %s2401_s3, 3  ;;  %p2408_p10 = scmp.lt.s32.totalorder %s2401_s3, %s3130_s4 }
  0x36   : > { %p2403_p2 = scmp.ne.s32.totalorder %s2401_s3, %s2402_s18  ;;  %p2409_p11 = scmp.lt.s32.totalorder %s2407_s24, %s2402_s18 }
  0x38   : > { %p2405_p7 = pnand %p2403_p2, %p2374_p3  ;;  %p2410_p12 = por %p2409_p11, %p2408_p10 }
  0x3a   : > { %p2406_p9 = pneg %p2405_p7 }
  0x3c   : > { %p2411_p13 = pnand %p2410_p12, %p2406_p9 }
  0x3e   : > { %2414 = shalt.err (!%p2411_p13)
}
  0x3f   : > { %2210 = dma.hbm_to_vmem [thread:$0]  (!%p2722_p0), %s317_s13, 48, %s319_s26, %s2730_s21  }
  0x40   : > { %s2113_s23 = sshll.u32 %s2594_s30, 6  ;;  %s329_s16 = scalar_lea.vmem [#allocation9], %s1869_s12 }
  0x41   : > { %s337_s11 = sshll.u32 %s329_s16, 4  ;;  %s334_s19 = scalar_lea.hbm %s3131_s5, %s2113_s23  ;;  %s338_s11 = int_to_ptr.vmem [resolvable:$true] %s337_s11 }
  0x42   : > { %s335_s3 = sshll.u32 %s334_s19, 4  ;;  %s3150_s1 = sld [smem:[#allocation20_spill]]  ;;  %s336_s3 = int_to_ptr.hbm [resolvable:$true] %s335_s3 }
  0x43   : > { %s2430_s15 = sshra.s32 %s336_s3, 4  ;;  %s2437_s13 = scalar_lea.hbm %s3131_s5, 128  ;;  %s2431_s15 = int_to_ptr.hbm [resolvable:$true] %s2430_s15 }
  0x44   : > { %s2432_s29 = scalar_lea.hbm %s2431_s15, 64  ;;  %p2438_p10 = scmp.lt.s32.totalorder %s2431_s15, %s3131_s5 }
  0x45   : > { %p2433_p2 = scmp.ne.s32.totalorder %s2431_s15, %s2432_s29  ;;  %p2439_p11 = scmp.lt.s32.totalorder %s2437_s13, %s2432_s29 }
  0x47   : > { %p2435_p7 = pnand %p2433_p2, %p2374_p3  ;;  %p2440_p12 = por %p2439_p11, %p2438_p10 }
  0x48   : > { %s265_s24 = sshll.u32 %s3150_s1, 4  ;;  %s266_s24 = int_to_ptr.hbm [resolvable:$true] %s265_s24 }
  0x49   : > { %p2436_p9 = pneg %p2435_p7 }
  0x4b   : > { %p2441_p13 = pnand %p2440_p12, %p2436_p9 }
  0x4d   : > { %2444 = shalt.err (!%p2441_p13)
}
  0x4e   : > { %s2601_s22 = smov 64   ;;  %s2602_s19 = smov 4  }
  0x4f   : > { %2213 = dma.hbm_to_vmem [thread:$0]  (!%p2722_p0), %s336_s3, 1024, %s338_s11, %s2730_s21, %s2601_s22, %s2601_s22, %s2602_s19  }
  0x50   : > { %s2603_s18 = smov [#allocation5]   ;;  %s362_s16 = scalar_lea.hbm %s3133_s7, %s2113_s23 }
  0x51   : > { %s267_s20 = sshll.u32 %s2603_s18, 4  ;;  %s363_s15 = sshll.u32 %s362_s16, 4  ;;  %s268_s20 = int_to_ptr.vmem [resolvable:$true] %s267_s20  ;;  %s364_s15 = int_to_ptr.hbm [resolvable:$true] %s363_s15 }
  0x52   : > { %2203 = dma.hbm_to_vmem [thread:$0]  (!%p2698_p8), %s266_s24, 1024, %s268_s20, [#allocation6], %s2601_s22, %s2601_s22, %s2602_s19  }
  0x53   : > { %s357_s29 = scalar_lea.vmem [#allocation10], %s1869_s12  ;;  %s2490_s0 = sshra.s32 %s364_s15, 4  ;;  %s2491_s0 = int_to_ptr.hbm [resolvable:$true] %s2490_s0 }
  0x54   : > { %s365_s13 = sshll.u32 %s357_s29, 4  ;;  %s2492_s1 = scalar_lea.hbm %s2491_s0, 64  ;;  %s366_s13 = int_to_ptr.vmem [resolvable:$true] %s365_s13 }
  0x55   : > { %p2493_p2 = scmp.ne.s32.totalorder %s2491_s0, %s2492_s1  ;;  %s2497_s23 = scalar_lea.hbm %s3133_s7, 128 }
  0x56   : > { %p2498_p8 = scmp.lt.s32.totalorder %s2491_s0, %s3133_s7  ;;  %p2499_p10 = scmp.lt.s32.totalorder %s2497_s23, %s2492_s1 }
  0x57   : > { %p2495_p7 = pnand %p2493_p2, %p2374_p3 }
  0x58   : > { %p2500_p11 = por %p2499_p10, %p2498_p8 }
  0x59   : > { %p2496_p9 = pneg %p2495_p7 }
  0x5b   : > { %p2501_p12 = pnand %p2500_p11, %p2496_p9 }
  0x5d   : > { %2504 = shalt.err (!%p2501_p12)
}
  0x5e   : > { %2216 = dma.hbm_to_vmem [thread:$0]  (!%p2722_p0), %s364_s15, 1024, %s366_s13, %s2730_s21, %s2601_s22, %s2601_s22, %s2602_s19  }
  0x5f   : > { %377 = sbr.rel (%p2690_p6) target bundleno = 2117 (0x845), region = 52 }
  0x64   : > { %2565 = dma.done.wait (%p105_p1), [#allocation3], 512  }
  0x65   : > { %2567 = vsyncadd (%p105_p1), [#allocation3], 4294966784 }
  0x66   : > { %2569 = dma.done.wait (%p105_p1), [#allocation6], 1024  }
  0x67   : > { %2571 = vsyncadd (%p105_p1), [#allocation6], 4294966272  ;;  %s389_s1 = sand.u32 1, %s2674_s9   ;;  %s391_s25 = sand.u32 1, %s2586_s28  }
  0x68   : > { %s2175_s27 = smul.u32 192, %s391_s25  ;;  %s390_s14 = scalar_lea.sflag [#allocation3], %s389_s1 }
  0x6a   : > { %s2816_s21 = scalar_lea.vmem [#allocation7], %s2175_s27 }
  0x6b   : > { %2573 = dma.done.wait (%p2683_p5), %s390_s14, 5168  }
  0x6c   : > { %2575 = vsyncadd (%p2683_p5), %s390_s14, 4294962128  ;;  %s2176_s12 = smul.u32 3, %s391_s25  ;;  %s1878_s24 = sshll.u32 %s391_s25, 6 }
  0x6d   : > { %p470_p6 = scmp.lt.s32.totalorder %s2674_s9, 1  ;;  %s2832_s16 = scalar_lea.vmem [#allocation9], %s1878_s24 }
  0x6e   : > { %s2830_s26 = scalar_lea.vmem [#allocation8], %s2176_s12  ;;  %s2834_s15 = scalar_lea.vmem [#allocation10], %s1878_s24 }
  0x6f   : > { %s2824_s22 = scalar_select %p470_p6, %s2674_s9, 1 }
  0x70   : > { %477 = sbr.rel (%p1865_p4) target bundleno = 289 (0x121), region = 80 }
  0x71   : > { %s472_s30 = scalar_lea.vmem %s3132_s6, %s2824_s22 }
  0x75   : > { %v2122_v0 = vld [vmem:[#allocation5 + $0x38] sm:$0xff]  ;;  %v2121_v1 = vld [vmem:[#allocation5 + $0x30] sm:$0xff]  ;;  %v2120_v2 = vld [vmem:[#allocation5 + $0x28] sm:$0xff] }
  0x76   : > { %552 = vmatpush.bf16.msra.mxu0 %v2122_v0  ;;  %2163 = vmatpush.bf16.msra.mxu1 %v2122_v0  ;;  %v2119_v3 = vld [vmem:[#allocation5 + $0x20] sm:$0xff]  ;;  %v2118_v4 = vld [vmem:[#allocation5 + $0x18] sm:$0xff]  ;;  %v2117_v5 = vld [vmem:[#allocation5 + $0x10] sm:$0xff] }
  0x77   : > { %v2116_v6 = vld [vmem:[#allocation5 + $0x8] sm:$0xff]  ;;  %v2115_v7 = vld [vmem:[#allocation5] sm:$0xff]  ;;  %v480_v10 = vld [vmem:[#allocation2 + $0x10] sm:$0xff] }
  0x78   : > { %v478_v8 = vld [vmem:[#allocation2] sm:$0xff]  ;;  %v479_v9 = vld [vmem:[#allocation2 + $0x8] sm:$0xff]  ;;  %v481_v11 = vld [vmem:[#allocation2 + $0x18] sm:$0xff] }
  0x79   : > { %v482_v12 = vpack.c.bf16 %v479_v9, %v478_v8  ;;  %v483_v13 = vpack.c.bf16 %v481_v11, %v480_v10  ;;  %v2270_v14 = vld [vmem:[%s3128_s2] ss:$0 sm:$0xff] }
  0x7a   : > { %553 = vmatpush.bf16.msra.mxu0 %v2121_v1  ;;  %2164 = vmatpush.bf16.msra.mxu1 %v2121_v1 }
  0x7e   : > { %554 = vmatpush.bf16.msra.mxu0 %v2120_v2  ;;  %2165 = vmatpush.bf16.msra.mxu1 %v2120_v2 }
  0x82   : > { %555 = vmatpush.bf16.msra.mxu0 %v2119_v3  ;;  %2166 = vmatpush.bf16.msra.mxu1 %v2119_v3 }
  0x86   : > { %556 = vmatpush.bf16.msra.mxu0 %v2118_v4  ;;  %2167 = vmatpush.bf16.msra.mxu1 %v2118_v4 }
  0x8a   : > { %557 = vmatpush.bf16.msra.mxu0 %v2117_v5  ;;  %2168 = vmatpush.bf16.msra.mxu1 %v2117_v5 }
  0x8e   : > { %558 = vmatpush.bf16.msra.mxu0 %v2116_v6  ;;  %2169 = vmatpush.bf16.msra.mxu1 %v2116_v6 }
  0x92   : > { %559 = vmatpush.bf16.msra.mxu0 %v2115_v7  ;;  %2170 = vmatpush.bf16.msra.mxu1 %v2115_v7 }
  0x95   : > { %560 = vmatmul.bf16.vlgmr.msra.gmra.mxu0 %v482_v12  ;;  %565 = vmatmul.bf16.vlgmr.msra.gmra.mxu1 %v483_v13 }
 0x112   : > { %v561_v15 = vpop.f32.mrf.mxu0  ;;  %v566_v16 = vpop.f32.mrf.mxu1 }
 0x113   : > { %v562_v17 = vadd.f32 %v2270_v14, %v561_v15  ;;  %v567_v18 = vadd.f32 %v2270_v14, %v566_v16 }
 0x115   : > { %v571_v19 = vadd.f32 %v562_v17, %v478_v8  ;;  %v573_v20 = vadd.f32 %v567_v18, %v480_v10 }
 0x117   : > { %575 = vst [vmem:[#allocation11] sm:$0xff] %v571_v19 }
 0x118   : > { %577 = vst [vmem:[#allocation11 + $0x10] sm:$0xff] %v573_v20 }
 0x11a   : > { %v563_v21 = vpop.f32.mrf.mxu0  ;;  %v568_v22 = vpop.f32.mrf.mxu1 }
 0x11b   : > { %v564_v23 = vadd.f32 %v2270_v14, %v563_v21  ;;  %v569_v24 = vadd.f32 %v2270_v14, %v568_v22 }
 0x11d   : > { %v572_v25 = vadd.f32 %v564_v23, %v479_v9  ;;  %v574_v26 = vadd.f32 %v569_v24, %v481_v11 }
 0x11f   : > { %576 = vst [vmem:[#allocation11 + $0x8] sm:$0xff] %v572_v25 }
 0x120   : > { %578 = vst [vmem:[#allocation11 + $0x18] sm:$0xff] %v574_v26 }
 0x121 PF: > { %v1999_v27 = vld [vmem:[%s2816_s21 + $0xa8] sm:$0xf]  ;;  %v2145_v28 = vld [vmem:[%s2816_s21 + $0xb0] sm:$0xf0]  ;;  %v2144_v29 = vld [vmem:[%s2816_s21 + $0xac] sm:$0xf] }
 0x122   : > { %v2000_v30 = vor.u32 %v2145_v28, %v1999_v27  ;;  %v2001_v31 = vld [vmem:[%s2816_s21 + $0xb4] sm:$0xf0]  ;;  %v1987_v32 = vld [vmem:[%s2816_s21 + $0x90] sm:$0xf]  ;;  %v2142_v33 = vld [vmem:[%s2816_s21 + $0x98] sm:$0xf0] }
 0x123   : > { %v2004_v34 = vor.u32 %v2144_v29, %v2001_v31  ;;  %v2141_v35 = vld [vmem:[%s2816_s21 + $0x94] sm:$0xf]  ;;  %v1989_v36 = vld [vmem:[%s2816_s21 + $0x9c] sm:$0xf0]  ;;  %v1988_v37 = vor.u32 %v2142_v33, %v1987_v32  ;;  %v1975_v39 = vld [vmem:[%s2816_s21 + $0x78] sm:$0xf] }
 0x124   : > { %753 = vmatpush.bf16.msra.mxu0 %v2000_v30  ;;  %v1992_v38 = vor.u32 %v2141_v35, %v1989_v36  ;;  %v2139_v40 = vld [vmem:[%s2816_s21 + $0x80] sm:$0xf0]  ;;  %v2138_v41 = vld [vmem:[%s2816_s21 + $0x7c] sm:$0xf]  ;;  %v1977_v42 = vld [vmem:[%s2816_s21 + $0x84] sm:$0xf0] }
 0x125   : > { %772 = vmatpush.bf16.msra.mxu1 %v2004_v34  ;;  %v1976_v43 = vor.u32 %v2139_v40, %v1975_v39  ;;  %v1980_v44 = vor.u32 %v2138_v41, %v1977_v42  ;;  %v1963_v45 = vld [vmem:[%s2816_s21 + $0x60] sm:$0xf]  ;;  %v2136_v46 = vld [vmem:[%s2816_s21 + $0x68] sm:$0xf0]  ;;  %v2135_v47 = vld [vmem:[%s2816_s21 + $0x64] sm:$0xf] }
 0x126   : > { %v1965_v48 = vld [vmem:[%s2816_s21 + $0x6c] sm:$0xf0]  ;;  %v1964_v49 = vor.u32 %v2136_v46, %v1963_v45  ;;  %v1951_v51 = vld [vmem:[%s2816_s21 + $0x48] sm:$0xf]  ;;  %v2133_v52 = vld [vmem:[%s2816_s21 + $0x50] sm:$0xf0] }
 0x127   : > { %v1968_v50 = vor.u32 %v2135_v47, %v1965_v48  ;;  %v2132_v53 = vld [vmem:[%s2816_s21 + $0x4c] sm:$0xf]  ;;  %v1953_v54 = vld [vmem:[%s2816_s21 + $0x54] sm:$0xf0]  ;;  %v1952_v55 = vor.u32 %v2133_v52, %v1951_v51  ;;  %v1939_v57 = vld [vmem:[%s2816_s21 + $0x30] sm:$0xf] }
 0x128   : > { %754 = vmatpush.bf16.msra.mxu0 %v1988_v37  ;;  %v1956_v56 = vor.u32 %v2132_v53, %v1953_v54  ;;  %v2130_v58 = vld [vmem:[%s2816_s21 + $0x38] sm:$0xf0]  ;;  %v2129_v59 = vld [vmem:[%s2816_s21 + $0x34] sm:$0xf]  ;;  %v1941_v60 = vld [vmem:[%s2816_s21 + $0x3c] sm:$0xf0] }
 0x129   : > { %773 = vmatpush.bf16.msra.mxu1 %v1992_v38  ;;  %v1940_v61 = vor.u32 %v2130_v58, %v1939_v57  ;;  %v1944_v62 = vor.u32 %v2129_v59, %v1941_v60  ;;  %v1927_v63 = vld [vmem:[%s2816_s21 + $0x18] sm:$0xf]  ;;  %v2127_v0 = vld [vmem:[%s2816_s21 + $0x20] sm:$0xf0]  ;;  %v2126_v1 = vld [vmem:[%s2816_s21 + $0x1c] sm:$0xf] }
 0x12a   : > { %v1929_v2 = vld [vmem:[%s2816_s21 + $0x24] sm:$0xf0]  ;;  %v1928_v3 = vor.u32 %v2127_v0, %v1927_v63  ;;  %v1915_v5 = vld [vmem:[%s2816_s21] sm:$0xf]  ;;  %v2124_v6 = vld [vmem:[%s2816_s21 + $0x8] sm:$0xf0] }
 0x12b   : > { %v1932_v4 = vor.u32 %v2126_v1, %v1929_v2  ;;  %v2123_v7 = vld [vmem:[%s2816_s21 + $0x4] sm:$0xf]  ;;  %v1917_v8 = vld [vmem:[%s2816_s21 + $0xc] sm:$0xf0]  ;;  %v1916_v9 = vor.u32 %v2124_v6, %v1915_v5  ;;  %v581_v14 = vld [vmem:[#allocation11 + $0x10] sm:$0xff]  ;;  %vm832_vm0 = vcmask 261120  }
 0x12c   : > { %755 = vmatpush.bf16.msra.mxu0 %v1976_v43  ;;  %v579_v10 = vld [vmem:[#allocation11] sm:$0xff]  ;;  %v580_v11 = vld [vmem:[#allocation11 + $0x8] sm:$0xff]  ;;  %v1920_v12 = vor.u32 %v2123_v7, %v1917_v8  ;;  %v582_v15 = vld [vmem:[#allocation11 + $0x18] sm:$0xff]  ;;  %s2604_s13 = smov 96   ;;  %vm883_vm1 = vcmask 130048   ;;  %s2605_s0 = smov 64  }
 0x12d   : > { %774 = vmatpush.bf16.msra.mxu1 %v1980_v44  ;;  %v583_v13 = vpack.c.bf16 %v580_v11, %v579_v10  ;;  %v2873_v16 = vpack.c.bf16 %v582_v15, %v581_v14  ;;  %v2007_v17 = vld [vmem:[%s2816_s21 + $0xb0] sm:$0xf]  ;;  %v2146_v18 = vld [vmem:[%s2816_s21 + $0xb8] sm:$0xf0]  ;;  %v1995_v20 = vld [vmem:[%s2816_s21 + $0x98] sm:$0xf] }
 0x12e   : > { %v2008_v19 = vor.u32 %v2146_v18, %v2007_v17  ;;  %v2143_v21 = vld [vmem:[%s2816_s21 + $0xa0] sm:$0xf0]  ;;  %v1983_v23 = vld [vmem:[%s2816_s21 + $0x80] sm:$0xf]  ;;  %v2140_v24 = vld [vmem:[%s2816_s21 + $0x88] sm:$0xf0] }
 0x12f   : > { %v1996_v22 = vor.u32 %v2143_v21, %v1995_v20  ;;  %v1984_v25 = vor.u32 %v2140_v24, %v1983_v23  ;;  %v1971_v26 = vld [vmem:[%s2816_s21 + $0x68] sm:$0xf]  ;;  %v2137_v27 = vld [vmem:[%s2816_s21 + $0x70] sm:$0xf0]  ;;  %v1959_v29 = vld [vmem:[%s2816_s21 + $0x50] sm:$0xf] }
 0x130   : > { %756 = vmatpush.bf16.msra.mxu0 %v1964_v49  ;;  %791 = vmatpush.bf16.msra.mxu2 %v2008_v19  ;;  %v1972_v28 = vor.u32 %v2137_v27, %v1971_v26  ;;  %v2134_v30 = vld [vmem:[%s2816_s21 + $0x58] sm:$0xf0]  ;;  %v2888_v32 = vld [vmem:[%s2830_s26] sm:$0x7]  ;;  %v1947_v35 = vld [vmem:[%s2816_s21 + $0x38] sm:$0xf] }
 0x131   : > { %775 = vmatpush.bf16.msra.mxu1 %v1968_v50  ;;  %v1960_v31 = vor.u32 %v2134_v30, %v1959_v29  ;;  %v2131_v36 = vld [vmem:[%s2816_s21 + $0x40] sm:$0xf0]  ;;  %v620_v37 = vperm.slane %v2888_v32, 1  ;;  %v1935_v39 = vld [vmem:[%s2816_s21 + $0x20] sm:$0xf]  ;;  %v619_v43 = vperm.slane %v2888_v32, 0 }
 0x132   : > { %v1948_v38 = vor.u32 %v2131_v36, %v1947_v35  ;;  %v2128_v40 = vld [vmem:[%s2816_s21 + $0x28] sm:$0xf0]  ;;  %v1923_v46 = vld [vmem:[%s2816_s21 + $0x8] sm:$0xf]  ;;  %v2125_v47 = vld [vmem:[%s2816_s21 + $0x10] sm:$0xf0] }
 0x133   : > { %v1936_v41 = vor.u32 %v2128_v40, %v1935_v39  ;;  %v1924_v50 = vor.u32 %v2125_v47, %v1923_v46  ;;  %v621_v19 = vperm.slane %v2888_v32, 2  ;;  %s2606_s11 = smov 32   ;;  %s2607_s18 = smov [#allocation11]  }
 0x134   : > { %757 = vmatpush.bf16.msra.mxu0 %v1952_v55  ;;  %792 = vmatpush.bf16.msra.mxu2 %v1996_v22  ;;  %s1719_s17 = sshll.u32 %s2607_s18, 4  ;;  %s1721_s27 = sshll.u32 %s3134_s8, 4  ;;  %s1720_s17 = int_to_ptr.vmem [resolvable:$true] %s1719_s17  ;;  %s1722_s27 = int_to_ptr.hbm [resolvable:$true] %s1721_s27 }
 0x135   : > { %776 = vmatpush.bf16.msra.mxu1 %v1956_v56  ;;  %p2222_p1 = scmp.eq.s32.totalorder %s2674_s9, 1  ;;  %s2608_s14 = smov 128  }
 0x136   : > { %s2609_s21 = smov 8  }
 0x138   : > { %758 = vmatpush.bf16.msra.mxu0 %v1940_v61  ;;  %793 = vmatpush.bf16.msra.mxu2 %v1984_v25 }
 0x139   : > { %777 = vmatpush.bf16.msra.mxu1 %v1944_v62 }
 0x13c   : > { %759 = vmatpush.bf16.msra.mxu0 %v1928_v3  ;;  %794 = vmatpush.bf16.msra.mxu2 %v1972_v28 }
 0x13d   : > { %778 = vmatpush.bf16.msra.mxu1 %v1932_v4 }
 0x140   : > { %760 = vmatpush.bf16.msra.mxu0 %v1916_v9  ;;  %795 = vmatpush.bf16.msra.mxu2 %v1960_v31 }
 0x141   : > { %779 = vmatpush.bf16.msra.mxu1 %v1920_v12 }
 0x143   : > { %761 = vmatmul.bf16.vlgmr.msra.gmra.mxu0 %v583_v13 }
 0x144   : > { %780 = vmatmul.bf16.vlgmr.msra.gmra.mxu1 %v583_v13  ;;  %796 = vmatpush.bf16.msra.mxu2 %v1948_v38 }
 0x148   : > { %797 = vmatpush.bf16.msra.mxu2 %v1936_v41 }
 0x14c   : > { %798 = vmatpush.bf16.msra.mxu2 %v1924_v50 }
 0x14f   : > { %799 = vmatmul.bf16.vlgmr.msra.gmra.mxu2 %v583_v13 }
 0x153   : > { %766 = vmatmul.bf16.gmra.mxu0 %v2873_v16 }
 0x154   : > { %785 = vmatmul.bf16.gmra.mxu1 %v2873_v16 }
 0x15f   : > { %804 = vmatmul.bf16.gmra.mxu2 %v2873_v16 }
 0x1c0   : > { %v762_v33 = vpop.f32.mrf.mxu0 }
 0x1c1   : > { %v781_v34 = vpop.f32.mrf.mxu1  ;;  %v763_v51 = vadd.f32 %v762_v33, %v619_v43 }
 0x1c2   : > { %v782_v42 = vadd.f32 %v781_v34, %v620_v37 }
 0x1c3   : > { %v810_v56 = vpack.c.bf16 %v763_v51, %v763_v51 }
 0x1c4   : > { %v814_v48 = vpack.c.bf16 %v782_v42, %v782_v42 }
 0x1c5   : > { %v824_v62 = vunpack.c.l.b16 %v810_v56 }
 0x1c6   : > { %v829_v54 = vunpack.c.l.b16 %v814_v48 }
 0x1c8   : > { %v764_v44 = vpop.f32.mrf.mxu0 }
 0x1c9   : > { %v783_v45 = vpop.f32.mrf.mxu1  ;;  %v765_v52 = vadd.f32 %v764_v44, %v619_v43 }
 0x1ca   : > { %v784_v49 = vadd.f32 %v783_v45, %v620_v37 }
 0x1cb   : > { %v811_v57 = vpack.c.bf16 %v765_v52, %v765_v52 }
 0x1cc   : > { %v815_v53 = vpack.c.bf16 %v784_v49, %v784_v49 }
 0x1cd   : > { %v825_v63 = vunpack.c.l.b16 %v811_v57 }
 0x1ce   : > { %v830_v55 = vunpack.c.l.b16 %v815_v53 }
 0x1cf   : > { %v2904_v1 = vpack.c.b16 %v825_v63, %v824_v62 }
 0x1d0   : > { %v2898_v58 = vpack.c.b16 %v830_v55, %v829_v54  ;;  %v767_v59 = vpop.f32.mrf.mxu0 }
 0x1d1   : > { %v786_v60 = vpop.f32.mrf.mxu1  ;;  %v768_v6 = vadd.f32 %v767_v59, %v619_v43 }
 0x1d2   : > { %996 = vrot.lane.b32.xlu2 %v2898_v58, %s2604_s13  ;;  %v837_v61 = vsel %vm832_vm0, %v2898_v58, 0  ;;  %v787_v0 = vadd.f32 %v786_v60, %v620_v37  ;;  %v800_v20 = vpop.f32.mrf.mxu2 }
 0x1d3   : > { %846 = vmatpush.bf16.xpose.msra.mxu3 %v837_v61  ;;  %v812_v11 = vpack.c.bf16 %v768_v6, %v768_v6  ;;  %v801_v21 = vadd.f32 %v800_v20, %v621_v19 }
 0x1d4   : > { %v816_v4 = vpack.c.bf16 %v787_v0, %v787_v0 }
 0x1d5   : > { %v855_v15 = vunpack.c.l.b16 %v812_v11  ;;  %v818_v16 = vpack.c.bf16 %v801_v21, %v801_v21 }
 0x1d6   : > { %v860_v9 = vunpack.c.l.b16 %v816_v4 }
 0x1d7   : > { %v931_v25 = vunpack.c.l.b16 %v818_v16 }
 0x1d8   : > { %v769_v2 = vpop.f32.mrf.mxu0 }
 0x1d9   : > { %v788_v3 = vpop.f32.mrf.mxu1  ;;  %v770_v7 = vadd.f32 %v769_v2, %v619_v43 }
 0x1da   : > { %v789_v5 = vadd.f32 %v788_v3, %v620_v37  ;;  %994 = vrot.lane.b32.xlu2 %v2904_v1, %s2604_s13  ;;  %2009 = vmatmul.msk.bf16.vlgmr.msra.gmra.mxu3 %vm832_vm0, %v2904_v1  ;;  %v802_v22 = vpop.f32.mrf.mxu2 }
 0x1db   : > { %v813_v12 = vpack.c.bf16 %v770_v7, %v770_v7  ;;  %v803_v23 = vadd.f32 %v802_v22, %v621_v19 }
 0x1dc   : > { %v817_v8 = vpack.c.bf16 %v789_v5, %v789_v5 }
 0x1dd   : > { %v856_v17 = vunpack.c.l.b16 %v813_v12  ;;  %v819_v26 = vpack.c.bf16 %v803_v23, %v803_v23 }
 0x1de   : > { %v861_v10 = vunpack.c.l.b16 %v817_v8 }
 0x1df   : > { %v2915_v18 = vpack.c.b16 %v856_v17, %v855_v15  ;;  %v932_v28 = vunpack.c.l.b16 %v819_v26 }
 0x1e0   : > { %v2911_v13 = vpack.c.b16 %v861_v10, %v860_v9 }
 0x1e1   : > { %v2921_v29 = vpack.c.b16 %v932_v28, %v931_v25 }
 0x1e2   : > { %v867_v14 = vsel %vm832_vm0, %v2911_v13, 0  ;;  %v805_v36 = vpop.f32.mrf.mxu2 }
 0x1e3   : > { %876 = vmatpush.bf16.xpose.msrb.mxu3 %v867_v14  ;;  %v806_v37 = vadd.f32 %v805_v36, %v621_v19 }
 0x1e5   : > { %v820_v38 = vpack.c.bf16 %v806_v37, %v806_v37 }
 0x1e7   : > { %v959_v41 = vunpack.c.l.b16 %v820_v38 }
 0x1ea   : > { %2010 = vmatmul.msk.bf16.vlgmr.msrb.gmra.mxu3 %vm832_vm0, %v2915_v18  ;;  %v807_v39 = vpop.f32.mrf.mxu2 }
 0x1eb   : > { %945 = vmatpush.bf16.msra.mxu3 %v2921_v29  ;;  %v808_v40 = vadd.f32 %v807_v39, %v621_v19 }
 0x1ed   : > { %v821_v42 = vpack.c.bf16 %v808_v40, %v808_v40 }
 0x1ef   : > { %v960_v43 = vunpack.c.l.b16 %v821_v42 }
 0x1f1   : > { %v2933_v44 = vpack.c.b16 %v960_v43, %v959_v41 }
 0x1f3   : > { %973 = vmatpush.bf16.msrb.mxu3 %v2933_v44 }
 0x22c   : > { %v997_v61 = vpop.permute.xlu2 %996 }
 0x22d   : > { %v1002_v2 = vsel %vm832_vm0, %v997_v61, 0 }
 0x234   : > { %v995_v19 = vpop.permute.xlu2 %994 }
 0x25d   : > { %v848_v24 = vpop.f32.mrf.mxu3 }
 0x25e   : > { %v884_v27 = vsel %vm883_vm1, %v848_v24, -inf }
 0x25f   : > { %885 = vmax.xlane.f32.xlu0 %v884_v27 }
 0x265   : > { %v850_v30 = vpop.f32.mrf.mxu3 }
 0x266   : > { %v887_v31 = vsel %vm883_vm1, %v850_v30, -inf }
 0x267   : > { %888 = vmax.xlane.f32.xlu0 %v887_v31 }
 0x26d   : > { %v878_v32 = vpop.f32.mrf.mxu3 }
 0x26e   : > { %v890_v33 = vsel %vm883_vm1, %v878_v32, -inf }
 0x26f   : > { %891 = vmax.xlane.f32.xlu1 %v890_v33  ;;  %v2148_v33 = vld [vmem:[%s2832_s16 + $0x8] sm:$0xff] }
 0x275   : > { %v880_v34 = vpop.f32.mrf.mxu3 }
 0x276   : > { %v893_v35 = vsel %vm883_vm1, %v880_v34, -inf }
 0x277   : > { %894 = vmax.xlane.f32.xlu1 %v893_v35 }
 0x27b   : > { %1020 = vrot.lane.b32.xlu0 %v2911_v13, %s2604_s13 }
 0x283   : > { %1087 = vrot.lane.b32.xlu0 %v2921_v29, %s2604_s13 }
 0x28b   : > { %1223 = vrot.lane.b32.xlu0 %v2898_v58, %s2605_s0 }
 0x2d2   : > { %v886_v45 = vpop.xlane.xlu0 %885 }
 0x2d3   : > { %v896_v46 = vsub.f32 %v848_v24, %v886_v45 }
 0x2d5   : > { %v900_v47 = vmul.f32 1.442695, %v896_v46 }
 0x2d7   : > { %2272 = vpow2.f32 %v900_v47 }
 0x2da   : > { %v889_v48 = vpop.xlane.xlu0 %888 }
 0x2db   : > { %v897_v49 = vsub.f32 %v850_v30, %v889_v48 }
 0x2dd   : > { %v902_v50 = vmul.f32 1.442695, %v897_v49  ;;  %v2273_v51 = vpop.eup %2272 }
 0x2de   : > { %v920_v54 = vpack.c.bf16 %v2273_v51, %v2273_v51  ;;  %v908_v27 = vsel %vm883_vm1, %v2273_v51, 0.0 }
 0x2df   : > { %2274 = vpow2.f32 %v902_v50 }
 0x2e0   : > { %v926_v59 = vunpack.c.l.b16 %v920_v54 }
 0x2e2   : > { %v892_v52 = vpop.xlane.xlu1 %891 }
 0x2e3   : > { %v898_v53 = vsub.f32 %v878_v32, %v892_v52 }
 0x2e5   : > { %v2275_v55 = vpop.eup %2274  ;;  %v904_v57 = vmul.f32 1.442695, %v898_v53 }
 0x2e6   : > { %v921_v56 = vpack.c.bf16 %v2275_v55, %v2275_v55  ;;  %v911_v28 = vsel %vm883_vm1, %v2275_v55, 0.0 }
 0x2e7   : > { %2276 = vpow2.f32 %v904_v57 }
 0x2e8   : > { %v927_v60 = vunpack.c.l.b16 %v921_v56 }
 0x2ea   : > { %v928_v62 = vpack.c.b16 %v927_v60, %v926_v59  ;;  %v895_v63 = vpop.xlane.xlu1 %894 }
 0x2eb   : > { %v899_v0 = vsub.f32 %v880_v34, %v895_v63  ;;  %v2147_v34 = vld [vmem:[%s2832_s16] sm:$0xff] }
 0x2ec   : > { %2011 = vmatmul.msk.bf16.vlgmr.msra.gmra.mxu3 %vm883_vm1, %v928_v62 }
 0x2ed   : > { %v906_v3 = vmul.f32 1.442695, %v899_v0  ;;  %1011 = vmatpush.bf16.xpose.msra.mxu3 %v1002_v2  ;;  %v1021_v4 = vpop.permute.xlu0 %1020  ;;  %v2277_v6 = vpop.eup %2276 }
 0x2ee   : > { %v1026_v5 = vsel %vm832_vm0, %v1021_v4, 0  ;;  %v922_v7 = vpack.c.bf16 %v2277_v6, %v2277_v6  ;;  %v914_v30 = vsel %vm883_vm1, %v2277_v6, 0.0 }
 0x2ef   : > { %2278 = vpow2.f32 %v906_v3  ;;  %1035 = vmatpush.bf16.xpose.msrb.mxu1 %v1026_v5 }
 0x2f0   : > { %v954_v11 = vunpack.c.l.b16 %v922_v7 }
 0x2f5   : > { %v2939_v8 = vpop.eup %2278  ;;  %v1088_v9 = vpop.permute.xlu0 %1087 }
 0x2f6   : > { %v923_v10 = vpack.c.bf16 %v2939_v8, %v2939_v8  ;;  %1100 = vmatpush.bf16.msrb.mxu2 %v1088_v9  ;;  %v917_v63 = vsel %vm883_vm1, %v2939_v8, 0.0 }
 0x2f7   : > { %1208 = vmatpush.bf16.msra.mxu1 %v2148_v33 }
 0x2f8   : > { %v955_v12 = vunpack.c.l.b16 %v923_v10 }
 0x2fa   : > { %v956_v14 = vpack.c.b16 %v955_v12, %v954_v11 }
 0x2fb   : > { %1209 = vmatpush.bf16.msra.mxu1 %v2147_v34 }
 0x2fc   : > { %2012 = vmatmul.msk.bf16.vlgmr.msrb.gmra.mxu3 %vm883_vm1, %v956_v14 }
 0x2fd   : > { %v1224_v15 = vpop.permute.xlu0 %1223 }
 0x2fe   : > { %v1229_v17 = vsel %vm832_vm0, %v1224_v15, 0 }
 0x2ff   : > { %1238 = vmatpush.bf16.xpose.msra.mxu2 %v1229_v17 }
 0x30c   : > { %2013 = vmatmul.msk.bf16.vlgmr.msra.gmra.mxu3 %vm832_vm0, %v995_v19 }
 0x36f   : > { %v947_v20 = vpop.f32.mrf.mxu3 }
 0x377   : > { %v949_v21 = vpop.f32.mrf.mxu3 }
 0x37f   : > { %v2946_v16 = vpop.f32.mrf.mxu3 }
 0x387   : > { %v2948_v22 = vpop.f32.mrf.mxu3 }
 0x38f   : > { %v1013_v23 = vpop.f32.mrf.mxu3 }
 0x390   : > { %v1042_v24 = vsel %vm883_vm1, %v1013_v23, -inf }
 0x391   : > { %1043 = vmax.xlane.f32.xlu1 %v1042_v24 }
 0x397   : > { %v1015_v25 = vpop.f32.mrf.mxu3 }
 0x398   : > { %v1045_v26 = vsel %vm883_vm1, %v1015_v25, -inf }
 0x399   : > { %1046 = vmax.xlane.f32.xlu2 %v1045_v26 }
 0x3a1   : > { %909 = vadd.xlane.f32.xlu2 %v908_v27 }
 0x3a9   : > { %912 = vadd.xlane.f32.xlu2 %v911_v28 }
 0x3aa   : > { %1018 = vrot.lane.b32.xlu1 %v2915_v18, %s2604_s13 }
 0x3b2   : > { %1221 = vrot.lane.b32.xlu1 %v2904_v1, %s2605_s0 }
 0x3c1   : > { %1112 = vrot.lane.b32.xlu2 %v2933_v44, %s2604_s13 }
 0x3ea   : > { %915 = vadd.xlane.f32.xlu2 %v914_v30 }
 0x402   : > { %1417 = vrot.lane.b32.xlu2 %v2898_v58, %s2606_s11 }
 0x404   : > { %v1044_v31 = vpop.xlane.xlu1 %1043 }
 0x405   : > { %v1054_v32 = vsub.f32 %v1013_v23, %v1044_v31 }
 0x407   : > { %v1058_v35 = vmul.f32 1.442695, %v1054_v32 }
 0x409   : > { %2280 = vpow2.f32 %v1058_v35 }
 0x40a   : > { %1415 = vrot.lane.b32.xlu2 %v2904_v1, %s2606_s11 }
 0x40c   : > { %v1047_v36 = vpop.xlane.xlu2 %1046 }
 0x40d   : > { %v1055_v37 = vsub.f32 %v1015_v25, %v1047_v36 }
 0x40f   : > { %v1060_v38 = vmul.f32 1.442695, %v1055_v37  ;;  %v2969_v39 = vpop.eup %2280 }
 0x410   : > { %v1078_v40 = vpack.c.bf16 %v2969_v39, %v2969_v39 }
 0x411   : > { %2282 = vpow2.f32 %v1060_v38 }
 0x412   : > { %1441 = vrot.lane.b32.xlu2 %v2911_v13, %s2606_s11  ;;  %v1084_v42 = vunpack.c.l.b16 %v1078_v40 }
 0x414   : > { %v910_v58 = vpop.xlane.xlu2 %909 }
 0x417   : > { %v2973_v41 = vpop.eup %2282 }
 0x418   : > { %v1079_v1 = vpack.c.bf16 %v2973_v41, %v2973_v41 }
 0x41a   : > { %v1085_v43 = vunpack.c.l.b16 %v1079_v1 }
 0x41c   : > { %v1019_v45 = vpop.permute.xlu1 %1018  ;;  %v913_v46 = vpop.xlane.xlu2 %912  ;;  %v1086_v47 = vpack.c.b16 %v1085_v43, %v1084_v42 }
 0x41d   : > { %2014 = vmatmul.msk.bf16.vlgmr.msrb.gmra.mxu1 %vm832_vm0, %v1019_v45  ;;  %2284 = vrcp.f32 %v913_v46 }
 0x41e   : > { %2015 = vmatmul.msk.bf16.vlgmr.msrb.gmra.mxu2 %vm883_vm1, %v1086_v47  ;;  %2286 = vrcp.f32 %v910_v58 }
 0x423   : > { %v2285_v48 = vpop.eup %2284 }
 0x424   : > { %v1113_v49 = vpop.permute.xlu2 %1112  ;;  %v2287_v50 = vpop.eup %2286  ;;  %v985_v51 = vmul.f32 %v2285_v48, %v949_v21 }
 0x425   : > { %1125 = vmatpush.bf16.msrb.mxu3 %v1113_v49  ;;  %v984_v52 = vmul.f32 %v2287_v50, %v947_v20  ;;  %v1222_v54 = vpop.permute.xlu1 %1221 }
 0x427   : > { %v988_v53 = vpack.c.bf16 %v985_v51, %v984_v52 }
 0x42d   : > { %2039 = vmatmul.msk.bf16.vlgmr.msra.gmra.mxu1 %vm832_vm0, %v988_v53 }
 0x42e   : > { %2041 = vmatmul.msk.bf16.vlgmr.msra.gmra.mxu2 %vm832_vm0, %v1222_v54 }
 0x45d   : > { %v916_v55 = vpop.xlane.xlu2 %915 }
 0x465   : > { %v1418_v56 = vpop.permute.xlu2 %1417 }
 0x466   : > { %v1423_v57 = vsel %vm832_vm0, %v1418_v56, 0 }
 0x467   : > { %1432 = vmatpush.bf16.xpose.msrb.mxu1 %v1423_v57 }
 0x46d   : > { %v1416_v32 = vpop.permute.xlu2 %1415 }
 0x475   : > { %v1442_v35 = vpop.permute.xlu2 %1441 }
 0x49a   : > { %v1037_v59 = vpop.f32.mrf.mxu1 }
 0x49b   : > { %v1048_v60 = vsel %vm883_vm1, %v1037_v59, -inf }
 0x49c   : > { %1049 = vmax.xlane.f32.xlu0 %v1048_v60 }
 0x4a1   : > { %v2988_v0 = vpop.f32.mrf.mxu2 }
 0x4a2   : > { %v1039_v61 = vpop.f32.mrf.mxu1 }
 0x4a3   : > { %v1051_v62 = vsel %vm883_vm1, %v1039_v61, -inf }
 0x4a4   : > { %1052 = vmax.xlane.f32.xlu1 %v1051_v62 }
 0x4a9   : > { %v2992_v2 = vpop.f32.mrf.mxu2 }
 0x4aa   : > { %v3024_v50 = vpop.f32.mrf.mxu1 }
 0x4ac   : > { %918 = vadd.xlane.f32.xlu1 %v917_v63 }
 0x4b0   : > { %1247 = vrot.lane.b32.xlu0 %v2911_v13, %s2605_s0 }
 0x4b1   : > { %v1240_v3 = vpop.f32.mrf.mxu2 }
 0x4b2   : > { %v1269_v4 = vsel %vm883_vm1, %v1240_v3, -inf  ;;  %v3026_v51 = vpop.f32.mrf.mxu1 }
 0x4b9   : > { %v1242_v5 = vpop.f32.mrf.mxu2 }
 0x4ba   : > { %v1272_v6 = vsel %vm883_vm1, %v1242_v5, -inf }
 0x4c5   : > { %1245 = vrot.lane.b32.xlu1 %v2915_v18, %s2605_s0 }
 0x4da   : > { %1270 = vmax.xlane.f32.xlu0 %v1269_v4 }
 0x4ee   : > { %1314 = vrot.lane.b32.xlu0 %v2921_v29, %s2605_s0 }
 0x4ef   : > { %1273 = vmax.xlane.f32.xlu1 %v1272_v6 }
 0x508   : > { %1439 = vrot.lane.b32.xlu1 %v2915_v18, %s2606_s11 }
 0x50f   : > { %v1050_v13 = vpop.xlane.xlu0 %1049 }
 0x510   : > { %v1056_v7 = vsub.f32 %v1037_v59, %v1050_v13  ;;  %1339 = vrot.lane.b32.xlu1 %v2933_v44, %s2605_s0 }
 0x512   : > { %v1062_v8 = vmul.f32 1.442695, %v1056_v7 }
 0x514   : > { %2288 = vpow2.f32 %v1062_v8 }
 0x517   : > { %v1053_v9 = vpop.xlane.xlu1 %1052 }
 0x518   : > { %v1057_v10 = vsub.f32 %v1039_v61, %v1053_v9  ;;  %v1069_v61 = vsel %vm883_vm1, %v2973_v41, 0.0  ;;  %v1066_v41 = vsel %vm883_vm1, %v2969_v39, 0.0 }
 0x51a   : > { %v1064_v11 = vmul.f32 1.442695, %v1057_v10  ;;  %v3002_v12 = vpop.eup %2288 }
 0x51b   : > { %v1080_v15 = vpack.c.bf16 %v3002_v12, %v3002_v12 }
 0x51c   : > { %2290 = vpow2.f32 %v1064_v11 }
 0x51d   : > { %2292 = vrcp.f32 %v916_v55  ;;  %v1109_v23 = vunpack.c.l.b16 %v1080_v15 }
 0x51f   : > { %v919_v14 = vpop.xlane.xlu1 %918 }
 0x520   : > { %2294 = vrcp.f32 %v919_v14 }
 0x522   : > { %v3006_v18 = vpop.eup %2290  ;;  %v1248_v17 = vpop.permute.xlu0 %1247 }
 0x523   : > { %v1081_v19 = vpack.c.bf16 %v3006_v18, %v3006_v18  ;;  %v1253_v20 = vsel %vm832_vm0, %v1248_v17, 0  ;;  %v2293_v21 = vpop.eup %2292 }
 0x524   : > { %1262 = vmatpush.bf16.xpose.msra.mxu3 %v1253_v20  ;;  %v986_v27 = vmul.f32 %v2293_v21, %v2946_v16  ;;  %v1447_v16 = vsel %vm832_vm0, %v1442_v35, 0 }
 0x525   : > { %v1110_v24 = vunpack.c.l.b16 %v1081_v19 }
 0x526   : > { %v2295_v25 = vpop.eup %2294 }
 0x527   : > { %v1111_v26 = vpack.c.b16 %v1110_v24, %v1109_v23  ;;  %v987_v28 = vmul.f32 %v2295_v25, %v2948_v22 }
 0x529   : > { %2016 = vmatmul.msk.bf16.vlgmr.msrb.gmra.mxu3 %vm883_vm1, %v1111_v26  ;;  %v989_v30 = vpack.c.bf16 %v987_v28, %v986_v27 }
 0x52b   : > { %2040 = vmatmul.msk.bf16.gmra.mxu1 %vm832_vm0, %v989_v30 }
 0x537   : > { %v1246_v31 = vpop.permute.xlu1 %1245 }
 0x539   : > { %2042 = vmatmul.msk.bf16.vlgmr.msra.gmra.mxu3 %vm832_vm0, %v1246_v31 }
 0x53b   : > { %2059 = vmatmul.msk.bf16.vlgmr.msrb.gmra.mxu1 %vm832_vm0, %v1416_v32 }
 0x54d   : > { %v1271_v33 = vpop.xlane.xlu0 %1270 }
 0x54e   : > { %v1281_v34 = vsub.f32 %v1240_v3, %v1271_v33 }
 0x550   : > { %v1285_v36 = vmul.f32 1.442695, %v1281_v34 }
 0x552   : > { %2296 = vpow2.f32 %v1285_v36 }
 0x558   : > { %v3018_v40 = vpop.eup %2296 }
 0x559   : > { %v1305_v1 = vpack.c.bf16 %v3018_v40, %v3018_v40 }
 0x55b   : > { %v1311_v45 = vunpack.c.l.b16 %v1305_v1 }
 0x560   : > { %v1315_v37 = vpop.permute.xlu0 %1314 }
 0x561   : > { %1327 = vmatpush.bf16.msrb.mxu2 %v1315_v37 }
 0x562   : > { %v1274_v22 = vpop.xlane.xlu1 %1273 }
 0x563   : > { %v1282_v38 = vsub.f32 %v1242_v5, %v1274_v22  ;;  %v1072_v5 = vsel %vm883_vm1, %v3002_v12, 0.0  ;;  %v1075_v22 = vsel %vm883_vm1, %v3006_v18, 0.0 }
 0x565   : > { %1456 = vmatpush.bf16.xpose.msra.mxu2 %v1447_v16  ;;  %v1287_v58 = vmul.f32 1.442695, %v1282_v38  ;;  %v1293_v16 = vsel %vm883_vm1, %v3018_v40, 0.0 }
 0x567   : > { %2298 = vpow2.f32 %v1287_v58 }
 0x56d   : > { %v2299_v42 = vpop.eup %2298 }
 0x56e   : > { %v1306_v43 = vpack.c.bf16 %v2299_v42, %v2299_v42  ;;  %v1296_v9 = vsel %vm883_vm1, %v2299_v42, 0.0 }
 0x570   : > { %v1312_v46 = vunpack.c.l.b16 %v1306_v43 }
 0x572   : > { %v1313_v47 = vpack.c.b16 %v1312_v46, %v1311_v45  ;;  %v2150_v45 = vld [vmem:[%s2832_s16 + $0x18] sm:$0xff]  ;;  %v2149_v46 = vld [vmem:[%s2832_s16 + $0x10] sm:$0xff] }
 0x573   : > { %1171 = vmatpush.bf16.msrb.mxu0 %v2150_v45 }
 0x574   : > { %2043 = vmatmul.msk.bf16.vlgmr.msrb.gmra.mxu2 %vm883_vm1, %v1313_v47 }
 0x577   : > { %1172 = vmatpush.bf16.msrb.mxu0 %v2149_v46 }
 0x57a   : > { %v1440_v48 = vpop.permute.xlu1 %1439 }
 0x582   : > { %v1340_v49 = vpop.permute.xlu1 %1339 }
 0x583   : > { %1352 = vmatpush.bf16.msrb.mxu3 %v1340_v49 }
 0x584   : > { %2060 = vmatmul.msk.bf16.vlgmr.msra.gmra.mxu2 %vm832_vm0, %v1440_v48 }
 0x5a8   : > { %v3028_v52 = vpop.f32.mrf.mxu1 }
 0x5ac   : > { %v3030_v53 = vpop.f32.mrf.mxu3 }
 0x5b0   : > { %v3032_v54 = vpop.f32.mrf.mxu1 }
 0x5b4   : > { %v3034_v55 = vpop.f32.mrf.mxu3 }
 0x5b8   : > { %v1434_v56 = vpop.f32.mrf.mxu1 }
 0x5b9   : > { %v1463_v57 = vsel %vm883_vm1, %v1434_v56, -inf }
 0x5ba   : > { %1464 = vmax.xlane.f32.xlu1 %v1463_v57 }
 0x5bc   : > { %v1264_v59 = vpop.f32.mrf.mxu3 }
 0x5bd   : > { %v1275_v60 = vsel %vm883_vm1, %v1264_v59, -inf }
 0x5be   : > { %1276 = vmax.xlane.f32.xlu0 %v1275_v60 }
 0x5c0   : > { %v1436_v62 = vpop.f32.mrf.mxu1 }
 0x5c1   : > { %v1466_v3 = vsel %vm883_vm1, %v1436_v62, -inf }
 0x5c2   : > { %1070 = vadd.xlane.f32.xlu1 %v1069_v61 }
 0x5c4   : > { %v1266_v63 = vpop.f32.mrf.mxu3 }
 0x5c5   : > { %v1278_v4 = vsel %vm883_vm1, %v1266_v63, -inf }
 0x5c6   : > { %1467 = vmax.xlane.f32.xlu0 %v1466_v3  ;;  %1279 = vmax.xlane.f32.xlu2 %v1278_v4 }
 0x5ca   : > { %1073 = vadd.xlane.f32.xlu1 %v1072_v5 }
 0x5de   : > { %1508 = vrot.lane.b32.xlu2 %v2921_v29, %s2606_s11 }
 0x5f7   : > { %v3046_v6 = vpop.f32.mrf.mxu2 }
 0x5ff   : > { %v3048_v13 = vpop.f32.mrf.mxu2 }
 0x607   : > { %1067 = vadd.xlane.f32.xlu2 %v1066_v41  ;;  %v1458_v7 = vpop.f32.mrf.mxu2 }
 0x608   : > { %v1469_v8 = vsel %vm883_vm1, %v1458_v7, -inf }
 0x609   : > { %1470 = vmax.xlane.f32.xlu0 %v1469_v8 }
 0x60f   : > { %1297 = vadd.xlane.f32.xlu2 %v1296_v9  ;;  %v3054_v10 = vpop.f32.mrf.mxu2 }
 0x610   : > { %v1472_v29 = vsel %vm883_vm1, %v3054_v10, -inf }
 0x611   : > { %1473 = vmax.xlane.f32.xlu0 %v1472_v29 }
 0x625   : > { %1533 = vrot.lane.b32.xlu0 %v2933_v44, %s2606_s11 }
 0x62d   : > { %v1465_v11 = vpop.xlane.xlu1 %1464 }
 0x62e   : > { %v1475_v12 = vsub.f32 %v1434_v56, %v1465_v11 }
 0x630   : > { %v1479_v39 = vmul.f32 1.442695, %v1475_v12 }
 0x631   : > { %v1277_v14 = vpop.xlane.xlu0 %1276 }
 0x632   : > { %2300 = vpow2.f32 %v1479_v39  ;;  %v1283_v15 = vsub.f32 %v1264_v59, %v1277_v14  ;;  %v2152_v14 = vld [vmem:[%s2832_s16 + $0x28] sm:$0xff] }
 0x633   : > { %1398 = vmatpush.bf16.msra.mxu0 %v2152_v14 }
 0x634   : > { %v1289_v17 = vmul.f32 1.442695, %v1283_v15  ;;  %v2151_v15 = vld [vmem:[%s2832_s16 + $0x20] sm:$0xff] }
 0x635   : > { %v1071_v47 = vpop.xlane.xlu1 %1070 }
 0x636   : > { %2302 = vpow2.f32 %v1289_v17 }
 0x637   : > { %1399 = vmatpush.bf16.msra.mxu0 %v2151_v15 }
 0x638   : > { %v2301_v19 = vpop.eup %2300 }
 0x639   : > { %v1468_v20 = vpop.xlane.xlu0 %1467  ;;  %v1280_v21 = vpop.xlane.xlu2 %1279  ;;  %v1487_v23 = vsel %vm883_vm1, %v2301_v19, 0.0  ;;  %v1499_v58 = vpack.c.bf16 %v2301_v19, %v2301_v19  ;;  %v2154_v19 = vld [vmem:[%s2832_s16 + $0x38] sm:$0xff] }
 0x63a   : > { %v1476_v24 = vsub.f32 %v1436_v62, %v1468_v20  ;;  %v1284_v25 = vsub.f32 %v1266_v63, %v1280_v21  ;;  %1488 = vadd.xlane.f32.xlu1 %v1487_v23  ;;  %1592 = vmatpush.bf16.msrb.mxu2 %v2154_v19 }
 0x63b   : > { %v1505_v42 = vunpack.c.l.b16 %v1499_v58 }
 0x63c   : > { %v1481_v26 = vmul.f32 1.442695, %v1476_v24  ;;  %v1291_v27 = vmul.f32 1.442695, %v1284_v25  ;;  %v2303_v44 = vpop.eup %2302  ;;  %v2153_v24 = vld [vmem:[%s2832_s16 + $0x30] sm:$0xff] }
 0x63d   : > { %v1307_v31 = vpack.c.bf16 %v2303_v44, %v2303_v44  ;;  %v1074_v39 = vpop.xlane.xlu1 %1073 }
 0x63e   : > { %2304 = vpow2.f32 %v1481_v26  ;;  %1593 = vmatpush.bf16.msrb.mxu2 %v2153_v24  ;;  %v2271_v24 = vld [vmem:[%s472_s30] ss:$0 sm:$0xff] }
 0x63f   : > { %2306 = vpow2.f32 %v1291_v27  ;;  %v1336_v35 = vunpack.c.l.b16 %v1307_v31 }
 0x640   : > { %2308 = vrcp.f32 %v1071_v47 }
 0x641   : > { %v1509_v28 = vpop.permute.xlu2 %1508 }
 0x642   : > { %1521 = vmatpush.bf16.msra.mxu3 %v1509_v28 }
 0x644   : > { %v2305_v30 = vpop.eup %2304 }
 0x645   : > { %v2307_v32 = vpop.eup %2306  ;;  %v1490_v33 = vsel %vm883_vm1, %v2305_v30, 0.0  ;;  %v1500_v38 = vpack.c.bf16 %v2305_v30, %v2305_v30 }
 0x646   : > { %v1308_v34 = vpack.c.bf16 %v2307_v32, %v2307_v32  ;;  %1491 = vadd.xlane.f32.xlu1 %v1490_v33  ;;  %v2309_v56 = vpop.eup %2308  ;;  %v1302_v11 = vsel %vm883_vm1, %v2307_v32, 0.0 }
 0x647   : > { %v1506_v1 = vunpack.c.l.b16 %v1500_v38  ;;  %v1137_v59 = vmul.f32 %v2309_v56, %v2992_v2  ;;  %v1299_v2 = vsel %vm883_vm1, %v2303_v44, 0.0 }
 0x648   : > { %v1337_v36 = vunpack.c.l.b16 %v1308_v34 }
 0x649   : > { %v1507_v43 = vpack.c.b16 %v1506_v1, %v1505_v42 }
 0x64a   : > { %v1338_v37 = vpack.c.b16 %v1337_v36, %v1336_v35 }
 0x64c   : > { %2044 = vmatmul.msk.bf16.vlgmr.msrb.gmra.mxu3 %vm883_vm1, %v1338_v37 }
 0x64e   : > { %1294 = vadd.xlane.f32.xlu1 %v1293_v16 }
 0x64f   : > { %1076 = vadd.xlane.f32.xlu0 %v1075_v22 }
 0x65c   : > { %2061 = vmatmul.msk.bf16.vlgmr.msra.gmra.mxu3 %vm883_vm1, %v1507_v43 }
 0x67a   : > { %v1068_v48 = vpop.xlane.xlu2 %1067 }
 0x67b   : > { %2310 = vrcp.f32 %v1068_v48 }
 0x67c   : > { %v1471_v40 = vpop.xlane.xlu0 %1470 }
 0x67d   : > { %v1477_v49 = vsub.f32 %v1458_v7, %v1471_v40 }
 0x67f   : > { %v1483_v18 = vmul.f32 1.442695, %v1477_v49 }
 0x681   : > { %v2311_v57 = vpop.eup %2310  ;;  %2312 = vpow2.f32 %v1483_v18 }
 0x682   : > { %v1136_v60 = vmul.f32 %v2311_v57, %v2988_v0  ;;  %v1298_v30 = vpop.xlane.xlu2 %1297 }
 0x684   : > { %v1474_v61 = vpop.xlane.xlu0 %1473  ;;  %v1140_v62 = vpack.c.bf16 %v1137_v59, %v1136_v60 }
 0x685   : > { %v1478_v63 = vsub.f32 %v3054_v10, %v1474_v61 }
 0x686   : > { %2029 = vmatmul.msk.bf16.vlgmr.msrb.gmra.mxu0 %vm832_vm0, %v1140_v62  ;;  %v2162_v62 = vld [vmem:[%s2834_s15 + $0x38] sm:$0xff] }
 0x687   : > { %v2313_v3 = vpop.eup %2312  ;;  %v1485_v4 = vmul.f32 1.442695, %v1478_v63  ;;  %1687 = vmatpush.bf16.msrb.mxu0 %v2162_v62 }
 0x688   : > { %v1493_v5 = vsel %vm883_vm1, %v2313_v3, 0.0  ;;  %v1501_v8 = vpack.c.bf16 %v2313_v3, %v2313_v3  ;;  %v2161_v3 = vld [vmem:[%s2834_s15 + $0x30] sm:$0xff] }
 0x689   : > { %2314 = vpow2.f32 %v1485_v4  ;;  %1494 = vadd.xlane.f32.xlu1 %v1493_v5  ;;  %v2160_v4 = vld [vmem:[%s2834_s15 + $0x28] sm:$0xff]  ;;  %v2159_v5 = vld [vmem:[%s2834_s15 + $0x20] sm:$0xff] }
 0x68a   : > { %v1530_v10 = vunpack.c.l.b16 %v1501_v8  ;;  %2316 = vrcp.f32 %v1074_v39  ;;  %v2156_v8 = vld [vmem:[%s2834_s15 + $0x8] sm:$0xff] }
 0x68b   : > { %1688 = vmatpush.bf16.msrb.mxu0 %v2161_v3 }
 0x68f   : > { %v2315_v41 = vpop.eup %2314  ;;  %1689 = vmatpush.bf16.msrb.mxu0 %v2160_v4 }
 0x690   : > { %v1496_v7 = vsel %vm883_vm1, %v2315_v41, 0.0  ;;  %v1502_v0 = vpack.c.bf16 %v2315_v41, %v2315_v41  ;;  %v2317_v23 = vpop.eup %2316 }
 0x691   : > { %1497 = vadd.xlane.f32.xlu2 %v1496_v7  ;;  %1300 = vadd.xlane.f32.xlu1 %v1299_v2  ;;  %v1138_v26 = vmul.f32 %v2317_v23, %v3030_v53  ;;  %v2158_v7 = vld [vmem:[%s2834_s15 + $0x18] sm:$0xff]  ;;  %v2157_v2 = vld [vmem:[%s2834_s15 + $0x10] sm:$0xff] }
 0x692   : > { %v1531_v9 = vunpack.c.l.b16 %v1502_v0 }
 0x693   : > { %1690 = vmatpush.bf16.msrb.mxu0 %v2159_v5 }
 0x694   : > { %v1532_v12 = vpack.c.b16 %v1531_v9, %v1530_v10  ;;  %v2155_v9 = vld [vmem:[%s2834_s15] sm:$0xff] }
 0x697   : > { %v1534_v29 = vpop.permute.xlu0 %1533  ;;  %1691 = vmatpush.bf16.msrb.mxu0 %v2158_v7 }
 0x698   : > { %1546 = vmatpush.bf16.msra.mxu1 %v1534_v29 }
 0x699   : > { %1303 = vadd.xlane.f32.xlu2 %v1302_v11 }
 0x69b   : > { %2062 = vmatmul.msk.bf16.vlgmr.msra.gmra.mxu1 %vm883_vm1, %v1532_v12  ;;  %1692 = vmatpush.bf16.msrb.mxu0 %v2157_v2 }
 0x69f   : > { %1693 = vmatpush.bf16.msrb.mxu0 %v2156_v8 }
 0x6a3   : > { %1694 = vmatpush.bf16.msrb.mxu0 %v2155_v9 }
 0x6ad   : > { %v1489_v17 = vpop.xlane.xlu1 %1488 }
 0x6b9   : > { %v1492_v20 = vpop.xlane.xlu1 %1491 }
 0x6c1   : > { %v1295_v44 = vpop.xlane.xlu1 %1294 }
 0x6c2   : > { %v1077_v21 = vpop.xlane.xlu0 %1076 }
 0x6c3   : > { %2318 = vrcp.f32 %v1077_v21  ;;  %v2336_v21 = vld [vmem:[#allocation11] sm:$0xff] }
 0x6c4   : > { %2320 = vrcp.f32 %v1295_v44 }
 0x6c5   : > { %2322 = vrcp.f32 %v1298_v30 }
 0x6c6   : > { %2324 = vrcp.f32 %v1489_v17 }
 0x6c7   : > { %2326 = vrcp.f32 %v1492_v20 }
 0x6c9   : > { %v2319_v25 = vpop.eup %2318 }
 0x6ca   : > { %v1139_v27 = vmul.f32 %v2319_v25, %v3034_v55  ;;  %v2321_v32 = vpop.eup %2320 }
 0x6cb   : > { %v2323_v33 = vpop.eup %2322  ;;  %v1363_v35 = vmul.f32 %v2321_v32, %v3046_v6 }
 0x6cc   : > { %v1141_v28 = vpack.c.bf16 %v1139_v27, %v1138_v26  ;;  %v1364_v36 = vmul.f32 %v2323_v33, %v3048_v13  ;;  %v2325_v55 = vpop.eup %2324  ;;  %v2337_v26 = vld [vmem:[#allocation11 + $0x8] sm:$0xff] }
 0x6cd   : > { %v2327_v16 = vpop.eup %2326 }
 0x6ce   : > { %2030 = vmatmul.msk.bf16.gmra.mxu0 %vm832_vm0, %v1141_v28  ;;  %v1367_v37 = vpack.c.bf16 %v1364_v36, %v1363_v35 }
 0x6cf   : > { %v1354_v31 = vpop.f32.mrf.mxu3 }
 0x6d7   : > { %v1356_v34 = vpop.f32.mrf.mxu3 }
 0x6de   : > { %2057 = vmatmul.msk.bf16.vlgmr.msra.gmra.mxu0 %vm832_vm0, %v1367_v37 }
 0x6df   : > { %v1523_v53 = vpop.f32.mrf.mxu3 }
 0x6e0   : > { %v1557_v38 = vmul.f32 %v2325_v55, %v1523_v53  ;;  %v2338_v53 = vld [vmem:[#allocation11 + $0x10] sm:$0xff] }
 0x6e7   : > { %v1525_v22 = vpop.f32.mrf.mxu3 }
 0x6e8   : > { %v1558_v58 = vmul.f32 %v2327_v16, %v1525_v22  ;;  %v2339_v22 = vld [vmem:[#allocation11 + $0x18] sm:$0xff] }
 0x6ea   : > { %v1561_v1 = vpack.c.bf16 %v1558_v58, %v1557_v38 }
 0x6ec   : > { %2075 = vmatmul.msk.bf16.vlgmr.msrb.gmra.mxu2 %vm832_vm0, %v1561_v1 }
 0x6fc   : > { %v1495_v42 = vpop.xlane.xlu1 %1494 }
 0x703   : > { %v1174_v63 = vpop.f32.mrf.mxu0 }
 0x704   : > { %v1498_v43 = vpop.xlane.xlu2 %1497  ;;  %v1301_v45 = vpop.xlane.xlu1 %1300  ;;  %v1212_v12 = vadd.f32 %v3024_v50, %v1174_v63 }
 0x705   : > { %2328 = vrcp.f32 %v1301_v45 }
 0x70b   : > { %v2329_v13 = vpop.eup %2328  ;;  %v1176_v41 = vpop.f32.mrf.mxu0 }
 0x70c   : > { %v1304_v6 = vpop.xlane.xlu2 %1303  ;;  %v1365_v47 = vmul.f32 %v2329_v13, %v1354_v31  ;;  %v1214_v15 = vadd.f32 %v3026_v51, %v1176_v41 }
 0x70d   : > { %2330 = vrcp.f32 %v1304_v6 }
 0x70e   : > { %2332 = vrcp.f32 %v1495_v42 }
 0x70f   : > { %2334 = vrcp.f32 %v1498_v43 }
 0x713   : > { %v2331_v46 = vpop.eup %2330 }
 0x714   : > { %v1366_v48 = vmul.f32 %v2331_v46, %v1356_v34  ;;  %v2333_v56 = vpop.eup %2332 }
 0x715   : > { %v2335_v18 = vpop.eup %2334 }
 0x716   : > { %v1368_v40 = vpack.c.bf16 %v1366_v48, %v1365_v47 }
 0x718   : > { %2058 = vmatmul.msk.bf16.gmra.mxu0 %vm832_vm0, %v1368_v40  ;;  %v1548_v49 = vpop.f32.mrf.mxu1 }
 0x719   : > { %v1559_v59 = vmul.f32 %v2333_v56, %v1548_v49 }
 0x720   : > { %v1550_v57 = vpop.f32.mrf.mxu1 }
 0x721   : > { %v1560_v60 = vmul.f32 %v2335_v18, %v1550_v57 }
 0x723   : > { %v1562_v61 = vpack.c.bf16 %v1560_v60, %v1559_v59 }
 0x725   : > { %2076 = vmatmul.msk.bf16.gmra.mxu2 %vm832_vm0, %v1562_v61 }
 0x74b   : > { %v1179_v0 = vpop.f32.mrf.mxu0 }
 0x74c   : > { %v1217_v51 = vadd.f32 %v3028_v52, %v1179_v0 }
 0x753   : > { %v1181_v10 = vpop.f32.mrf.mxu0 }
 0x754   : > { %v1219_v34 = vadd.f32 %v3032_v54, %v1181_v10 }
 0x75b   : > { %v1401_v29 = vpop.f32.mrf.mxu0 }
 0x75c   : > { %v1411_v39 = vadd.f32 %v1401_v29, %v1212_v12 }
 0x763   : > { %v1403_v14 = vpop.f32.mrf.mxu0 }
 0x764   : > { %v1412_v19 = vadd.f32 %v1403_v14, %v1214_v15 }
 0x76f   : > { %v1595_v11 = vpop.f32.mrf.mxu2 }
 0x770   : > { %v1605_v17 = vadd.f32 %v1595_v11, %v1411_v39 }
 0x772   : > { %v1609_v23 = vadd.f32 %v2336_v21, %v1605_v17 }
 0x774   : > { %v1617_v44 = vadd.f32 %v2271_v24, %v1609_v23 }
 0x777   : > { %v1597_v20 = vpop.f32.mrf.mxu2 }
 0x778   : > { %v1606_v25 = vadd.f32 %v1597_v20, %v1412_v19 }
 0x77a   : > { %v1610_v27 = vadd.f32 %v2337_v26, %v1606_v25 }
 0x77c   : > { %v1618_v28 = vadd.f32 %v2271_v24, %v1610_v27 }
 0x77e   : > { %v1621_v50 = vpack.c.bf16 %v1618_v28, %v1617_v44 }
 0x780   : > { %1695 = vmatmul.bf16.vlgmr.msrb.gmra.mxu0 %v1621_v50 }
 0x795   : > { %v1406_v30 = vpop.f32.mrf.mxu0 }
 0x796   : > { %v1413_v32 = vadd.f32 %v1406_v30, %v1217_v51 }
 0x79d   : > { %v1408_v33 = vpop.f32.mrf.mxu0 }
 0x79e   : > { %v1414_v36 = vadd.f32 %v1408_v33, %v1219_v34 }
 0x7a8   : > { %v1600_v31 = vpop.f32.mrf.mxu2 }
 0x7a9   : > { %v1607_v35 = vadd.f32 %v1600_v31, %v1413_v32 }
 0x7ab   : > { %v1611_v55 = vadd.f32 %v2338_v53, %v1607_v35 }
 0x7ad   : > { %v1619_v58 = vadd.f32 %v2271_v24, %v1611_v55 }
 0x7b0   : > { %v1602_v37 = vpop.f32.mrf.mxu2 }
 0x7b1   : > { %v1608_v16 = vadd.f32 %v1602_v37, %v1414_v36 }
 0x7b3   : > { %v1612_v38 = vadd.f32 %v2339_v22, %v1608_v16 }
 0x7b5   : > { %v1620_v1 = vadd.f32 %v2271_v24, %v1612_v38 }
 0x7b7   : > { %v1622_v42 = vpack.c.bf16 %v1620_v1, %v1619_v58 }
 0x7b9   : > { %1700 = vmatmul.bf16.gmra.mxu0 %v1622_v42 }
 0x7fd   : > { %v1696_v43 = vpop.f32.mrf.mxu0 }
 0x7fe   : > { %v1706_v45 = vadd.f32 %v1696_v43, %v1617_v44 }
 0x800   : > { %1710 = vst [vmem:[#allocation11] sm:$0xff] %v1706_v45 }
 0x805   : > { %v1698_v52 = vpop.f32.mrf.mxu0 }
 0x806   : > { %v1707_v6 = vadd.f32 %v1698_v52, %v1618_v28 }
 0x808   : > { %1711 = vst [vmem:[#allocation11 + $0x8] sm:$0xff] %v1707_v6 }
 0x836   : > { %v1701_v54 = vpop.f32.mrf.mxu0 }
 0x837   : > { %v1708_v13 = vadd.f32 %v1701_v54, %v1619_v58 }
 0x839   : > { %1712 = vst [vmem:[#allocation11 + $0x10] sm:$0xff] %v1708_v13 }
 0x83e   : > { %v1703_v46 = vpop.f32.mrf.mxu0 }
 0x83f   : > { %v1709_v47 = vadd.f32 %v1703_v46, %v1620_v1 }
 0x841   : > { %1713 = vst [vmem:[#allocation11 + $0x18] sm:$0xff] %v1709_v47 }
 0x842   : > { %2194 = dma.vmem_to_hbm [thread:$0]  (%p2222_p1), %s1720_s17, 512, %s1722_s27, [#allocation4], %s2608_s14, %s2608_s14, %s2609_s21  }
 0x843   : > { %2577 = dma.done.wait (%p2222_p1), [#allocation4], 512  }
 0x844   : > { %2579 = vsyncadd (%p2222_p1), [#allocation4], 4294966784 }
 0x845 PF: > { %s3151_s30 = sld [smem:[#allocation17_spill]]  ;;  %s3154_s27 = smov %s2586_s28 }
 0x846   : > { %s3152_s12 = sld [smem:[#allocation16_spill]] }
 0x847   : > { %s3153_s29 = sld [smem:[#allocation18_spill]] }
 0x84b   : > { %p18_p4 = scmp.ge.s32.totalorder %s3151_s30, 4  }
 0x84c   : > { %s3155_s28 = smov %s3152_s12 }
 0x84d   :  { %20 = sbr.rel (!%p18_p4) target bundleno = 8 (0x8), region = 139 }
 0x852   :  { %1738 = vsyncpa [#allocation3], 1 }
 0x853   :  { %1740 = vsyncpa [#allocation3 + $0x1], 1 }
 0x854   :  { %1741 = vsyncpa [#allocation6], 1 }
 0x855   :  { %1742 = vsyncpa [#allocation4], 1 }
 0x856   :  { %1744 = vsyncpa [#allocation4 + $0x1], 1 }

</bundles_post_ra>
